<compile_context>
chip_gen: v5e
topology: v5e:2x2
jax: 0.10.0
libtpu: 0.0.40
codegen_flags: <defaults>
</compile_context>

<pallas_src>
from functools import partial

import jax
import jax.numpy as jnp
from jax.experimental import pallas as pl
from jax.experimental.pallas import tpu as pltpu

HEAD_PAD = 128  # lane-dense padded output-channel count for the fused heads


# ------------------------------ Pallas kernel ------------------------------ #

def _pnet_kernel(x_ref, w1_ref, b1_ref, w2_ref, b2_ref, w3_ref, b3_ref,
                 wh_ref, bh_ref, o_ref, m_ref, pd_ref, *,
                 B, W, PW, PH, L1, LM, L2d, L3d, OH3, OW3):
    """Processes B images per grid step.

    Layouts (flat row-major spatial 2-D matrices, channels in lanes):
      x      : (LXP, 3)     flat row = y*W + x          (dense, width W)
      conv1  : (L1, 10)     same coordinates            (width W)
      pool   : (LM, 10)     4-way max, valid @ even pos (width W)   -> m_ref
      pooled : (PH*PW, 10)  compacted dense pool output (width PW)  -> pd_ref
      conv2  : (L2d, 16)    dense, width PW
      conv3  : (L3d, 32)    dense, width PW
      heads  : (L3d, 128)   only rows i*PW + j (j < OW3) are stored
    """
    bf16 = jnp.bfloat16

    def conv3x3(a_bf16, w_bf16, bias_f32, l_out, w_src):
        # a: (l_in, Cin) bf16 (already cast once).  w: (9*Cin, Cout) bf16.
        # Lane-concatenate the 9 shifted tap slices -> one fat-K MXU matmul.
        taps = [a_bf16[dy * w_src + dx: dy * w_src + dx + l_out, :]
                for dy in range(3) for dx in range(3)]
        lhs = jnp.concatenate(taps, axis=-1)             # (l_out, 9*Cin) bf16
        y = jnp.dot(lhs, w_bf16, preferred_element_type=jnp.float32)
        return jnp.maximum(y + bias_f32, 0.0)            # bias + ReLU in f32

    w1 = w1_ref[...]
    w2 = w2_ref[...]
    w3 = w3_ref[...]
    wh = wh_ref[...]
    b1 = b1_ref[...]
    b2 = b2_ref[...]
    b3 = b3_ref[...]
    bh = bh_ref[...]

    for b in range(B):                                   # images in this step
        x = x_ref[b]                                     # (LXP, 3) bf16
        y1 = conv3x3(x, w1, b1, L1, W)                   # (L1, 10) f32

        # 2x2 max-pool stride 2 (floor): 4-way max of shifted slices; valid
        # values live at rows 2p*W + 2q of the same coordinate grid.
        m = jnp.maximum(jnp.maximum(y1[0:LM, :], y1[1:LM + 1, :]),
                        jnp.maximum(y1[W:W + LM, :], y1[W + 1:W + 1 + LM, :]))
        m_ref[...] = m
        # Compact to the dense (PH, PW) grid: one stride-2 row read per pooled
        # row, written back densely, so the remaining layers see ~4x fewer rows.
        for p in range(PH):
            pd_ref[p * PW:(p + 1) * PW, :] = m_ref[pl.ds(2 * p * W, PW, 2), :]
        pooled = pd_ref[...].astype(bf16)                # (PH*PW, 10) bf16

        y2 = conv3x3(pooled, w2, b2, L2d, PW)            # (L2d, 16) f32
        y3 = conv3x3(y2.astype(bf16), w3, b3, L3d, PW)   # (L3d, 32) f32

        # Fused 1x1 heads: one lane-dense (L3d, 128) matmul; store only the
        # OH3*OW3 valid rows (compacted output, no wrapper-side gather).
        heads = jnp.dot(y3.astype(bf16), wh,
                        preferred_element_type=jnp.float32) + bh
        for i in range(OH3):
            o_ref[b, i * OW3:(i + 1) * OW3, :] = heads[i * PW:i * PW + OW3, :]


# --------------------------------- wrapper --------------------------------- #

def pnet_forward(params, x_nchw, *, images_per_step=1):
    N, C, H, W = x_nchw.shape
    OH1, OW1 = H - 2, W - 2                  # conv1 output
    PH, PW = OH1 // 2, OW1 // 2              # pool output (floor mode)
    OH2, OW2 = PH - 2, PW - 2                # conv2 output
    OH3, OW3 = OH2 - 2, OW2 - 2              # conv3 / heads output
    assert OH3 >= 1 and OW3 >= 1, "input too small for PNet"

    # Flat-row working lengths (see kernel docstring).
    LM = 2 * (PH - 1) * W + 2 * (PW - 1) + 1   # pool-max length (width-W grid)
    L1 = LM + W + 1                            # conv1 output length
    LX = L1 + 2 * W + 2                        # conv1 input rows needed
    L3d = (OH3 - 1) * PW + OW3                 # conv3 output length (width PW)
    L2d = L3d + 2 * PW + 2                     # conv2 output length (width PW)
    R3 = OH3 * OW3                             # valid (stored) head rows

    # Exact-fit slice-bound guards (review correctness note).
    assert L2d + 2 * PW + 2 == PH * PW
    assert L3d + 2 * PW + 2 == L2d
    LXP = max(H * W, LX)                       # pad input rows if needed

    def conv_w(w):   # torch (OC, IC, 3, 3) -> (9*IC, OC), tap-major, bf16
        oc, ic, kh, kw = w.shape
        return (jnp.transpose(w, (2, 3, 1, 0))
                .reshape(kh * kw * ic, oc).astype(jnp.bfloat16))

    def head_w(w):   # torch (OC, IC, 1, 1) -> (IC, OC)
        return jnp.transpose(w.reshape(w.shape[0], w.shape[1]), (1, 0))

    w1, b1 = conv_w(params["conv1_w"]), params["conv1_b"].reshape(1, -1)
    w2, b2 = conv_w(params["conv2_w"]), params["conv2_b"].reshape(1, -1)
    w3, b3 = conv_w(params["conv3_w"]), params["conv3_b"].reshape(1, -1)

    n_face = params["face_w"].shape[0]
    n_bbox = params["bbox_w"].shape[0]
    n_land = params["land_w"].shape[0]
    n_heads = n_face + n_bbox + n_land
    wh = jnp.concatenate([head_w(params["face_w"]), head_w(params["bbox_w"]),
                          head_w(params["land_w"])], axis=1)        # (32, 16)
    wh = jnp.pad(wh, ((0, 0), (0, HEAD_PAD - n_heads))).astype(jnp.bfloat16)
    bh = jnp.concatenate([params["face_b"], params["bbox_b"], params["land_b"]])
    bh = jnp.pad(bh, (0, HEAD_PAD - n_heads)).reshape(1, HEAD_PAD)

    # NCHW f32 -> flat row-major spatial rows, bf16 (cast once in the wrapper).
    B = max(1, min(images_per_step, N))
    G = -(-N // B)                             # grid steps
    NP = G * B
    x2d = jnp.transpose(x_nchw, (0, 2, 3, 1)).reshape(N, H * W, C)
    x2d = jnp.pad(x2d, ((0, NP - N), (0, LXP - H * W), (0, 0))).astype(jnp.bfloat16)

    kernel = partial(_pnet_kernel, B=B, W=W, PW=PW, PH=PH, L1=L1, LM=LM,
                     L2d=L2d, L3d=L3d, OH3=OH3, OW3=OW3)

    def rep(arr):
        return pl.BlockSpec(arr.shape, lambda n: (0,) * arr.ndim)

    # TODO(synk): for production-scale images add a spatial row-tiling grid axis
    # (2-row + halo overlap) so per-step VMEM stays within v7x's 64 MiB and both
    # TensorCores get work even at N=1.
    out = pl.pallas_call(
        kernel,
        out_shape=jax.ShapeDtypeStruct((NP, R3, HEAD_PAD), jnp.float32),
        grid=(G,),
        in_specs=[
            pl.BlockSpec((B, LXP, C), lambda n: (n, 0, 0)),
            rep(w1), rep(b1), rep(w2), rep(b2), rep(w3), rep(b3),
            rep(wh), rep(bh),
        ],
        out_specs=pl.BlockSpec((B, R3, HEAD_PAD), lambda n: (n, 0, 0)),
        scratch_shapes=[
            pltpu.VMEM((LM, 10), jnp.float32),       # pool max (width-W grid)
            pltpu.VMEM((PH * PW, 10), jnp.float32),  # dense pooled activation
        ],
        compiler_params=pltpu.CompilerParams(
            dimension_semantics=("parallel",)),
    )(x2d, w1, b1, w2, b2, w3, b3, wh, bh)

    # Cheap channel split + torch-style flatten (output rows are already dense).
    vals = out[:N, :, :n_heads].reshape(N, OH3, OW3, n_heads)

    def flatten_like_torch(y_nhwc):            # torch.flatten over NCHW
        return jnp.transpose(y_nhwc, (0, 3, 1, 2)).reshape(N, -1)

    facedet = flatten_like_torch(vals[..., :n_face])
    bbox = flatten_like_torch(vals[..., n_face:n_face + n_bbox])
    landmark = flatten_like_torch(vals[..., n_face + n_bbox:n_heads])
    return facedet, bbox, landmark


# ------------------------ parameters / reference ---------------------------- #

def init_params(key):
    shapes = {
        "conv1": (10, 3, 3, 3),
        "conv2": (16, 10, 3, 3),
        "conv3": (32, 16, 3, 3),
        "face": (2, 32, 1, 1),
        "bbox": (4, 32, 1, 1),
        "land": (10, 32, 1, 1),
    }
    params = {}
    keys = jax.random.split(key, 2 * len(shapes))
    for i, (name, shp) in enumerate(shapes.items()):
        params[name + "_w"] = 0.1 * jax.random.normal(keys[2 * i], shp, jnp.float32)
        params[name + "_b"] = 0.1 * jax.random.normal(keys[2 * i + 1], (shp[0],), jnp.float32)
    return params


def reference_forward(params, x_nchw):
    """Pure-JAX (XLA, f32) reference mirroring the PyTorch forward."""
    def conv(x, w, b):
        y = jax.lax.conv_general_dilated(
            x, w, (1, 1), "VALID",
            dimension_numbers=("NCHW", "OIHW", "NCHW"),
            precision=jax.lax.Precision.HIGHEST)
        return y + b[None, :, None, None]

    x = jax.nn.relu(conv(x_nchw, params["conv1_w"], params["conv1_b"]))
    N, C, H, W = x.shape
    x = x[:, :, :H // 2 * 2, :W // 2 * 2].reshape(
        N, C, H // 2, 2, W // 2, 2).max(axis=(3, 5))
    x = jax.nn.relu(conv(x, params["conv2_w"], params["conv2_b"]))
    x = jax.nn.relu(conv(x, params["conv3_w"], params["conv3_b"]))
    facedet = conv(x, params["face_w"], params["face_b"])
    bbox = conv(x, params["bbox_w"], params["bbox_b"])
    landmark = conv(x, params["land_w"], params["land_b"])
    f = lambda y: y.reshape(y.shape[0], -1)
    return f(facedet), f(bbox), f(landmark)


# ---------------------------------- main ------------------------------------ #

if __name__ == "__main__":
    key = jax.random.PRNGKey(0)
    pkey, xkey = jax.random.split(key)
    params = init_params(pkey)
    x = jax.random.normal(xkey, (2, 3, 16, 16), jnp.float32)  # NCHW like PyTorch

    fwd = jax.jit(pnet_forward)
    outs = jax.block_until_ready(fwd(params, x))

    refs = reference_forward(params, x)
    expected_shapes = [(2, 18), (2, 36), (2, 90)]  # (2*3*3, 4*3*3, 10*3*3)
    for o, r, es in zip(outs, refs, expected_shapes):
        assert o.shape == es and r.shape == es, (o.shape, r.shape, es)
        err = float(jnp.max(jnp.abs(o - r)))
        assert err < 2e-2, err  # bf16 MXU inputs, f32 accumulation / outputs

    # Batched-per-step path (v5e/v6e small-image amortization) must agree.
    fwd2 = jax.jit(partial(pnet_forward, images_per_step=2))
    outs2 = jax.block_until_ready(fwd2(params, x))
    for o, o2 in zip(outs, outs2):
        assert float(jnp.max(jnp.abs(o - o2))) < 1e-6

    print("KERNEL_OK")
</pallas_src>

<mosaic_0001>
module attributes {stable_mosaic.version = 11 : i64} {
  func.func @_pnet_kernel(%arg0: i32, %arg1: memref<1x256x3xbf16, #tpu.memory_space<vmem>>, %arg2: memref<27x10xbf16, #tpu.memory_space<vmem>>, %arg3: memref<1x10xf32, #tpu.memory_space<vmem>>, %arg4: memref<90x16xbf16, #tpu.memory_space<vmem>>, %arg5: memref<1x16xf32, #tpu.memory_space<vmem>>, %arg6: memref<144x32xbf16, #tpu.memory_space<vmem>>, %arg7: memref<1x32xf32, #tpu.memory_space<vmem>>, %arg8: memref<32x128xbf16, #tpu.memory_space<vmem>>, %arg9: memref<1x128xf32, #tpu.memory_space<vmem>>, %arg10: memref<1x9x128xf32, #tpu.memory_space<vmem>>, %arg11: memref<205x10xf32, #tpu.memory_space<vmem>>, %arg12: memref<49x10xf32, #tpu.memory_space<vmem>>) attributes {dimension_semantics = [#tpu.dimension_semantics<parallel>], iteration_bounds = array<i64: 2>, scalar_prefetch = 0 : i64, scratch_operands = 2 : i64, tpu.core_type = #tpu.core_type<tc>, window_params = [{transform_indices = @transform_0, window_bounds = array<i64: 1, 256, 3>}, {pipeline_mode = #tpu.pipeline_mode<synchronous>, transform_indices = @transform_1, window_bounds = array<i64: 27, 10>}, {pipeline_mode = #tpu.pipeline_mode<synchronous>, transform_indices = @transform_2, window_bounds = array<i64: 1, 10>}, {pipeline_mode = #tpu.pipeline_mode<synchronous>, transform_indices = @transform_3, window_bounds = array<i64: 90, 16>}, {pipeline_mode = #tpu.pipeline_mode<synchronous>, transform_indices = @transform_4, window_bounds = array<i64: 1, 16>}, {pipeline_mode = #tpu.pipeline_mode<synchronous>, transform_indices = @transform_5, window_bounds = array<i64: 144, 32>}, {pipeline_mode = #tpu.pipeline_mode<synchronous>, transform_indices = @transform_6, window_bounds = array<i64: 1, 32>}, {pipeline_mode = #tpu.pipeline_mode<synchronous>, transform_indices = @transform_7, window_bounds = array<i64: 32, 128>}, {pipeline_mode = #tpu.pipeline_mode<synchronous>, transform_indices = @transform_8, window_bounds = array<i64: 1, 128>}, {transform_indices = @transform_9, window_bounds = array<i64: 1, 9, 128>}]} {
    %c0 = arith.constant 0 : index
    %c0_0 = arith.constant 0 : index
    %0 = vector.load %arg2[%c0, %c0_0] : memref<27x10xbf16, #tpu.memory_space<vmem>>, vector<27x10xbf16>
    %c0_1 = arith.constant 0 : index
    %c0_2 = arith.constant 0 : index
    %1 = vector.load %arg4[%c0_1, %c0_2] : memref<90x16xbf16, #tpu.memory_space<vmem>>, vector<90x16xbf16>
    %c0_3 = arith.constant 0 : index
    %c0_4 = arith.constant 0 : index
    %2 = vector.load %arg6[%c0_3, %c0_4] : memref<144x32xbf16, #tpu.memory_space<vmem>>, vector<144x32xbf16>
    %c0_5 = arith.constant 0 : index
    %c0_6 = arith.constant 0 : index
    %3 = vector.load %arg8[%c0_5, %c0_6] : memref<32x128xbf16, #tpu.memory_space<vmem>>, vector<32x128xbf16>
    %c0_7 = arith.constant 0 : index
    %c0_8 = arith.constant 0 : index
    %4 = vector.load %arg3[%c0_7, %c0_8] : memref<1x10xf32, #tpu.memory_space<vmem>>, vector<1x10xf32>
    %c0_9 = arith.constant 0 : index
    %c0_10 = arith.constant 0 : index
    %5 = vector.load %arg5[%c0_9, %c0_10] : memref<1x16xf32, #tpu.memory_space<vmem>>, vector<1x16xf32>
    %c0_11 = arith.constant 0 : index
    %c0_12 = arith.constant 0 : index
    %6 = vector.load %arg7[%c0_11, %c0_12] : memref<1x32xf32, #tpu.memory_space<vmem>>, vector<1x32xf32>
    %c0_13 = arith.constant 0 : index
    %c0_14 = arith.constant 0 : index
    %7 = vector.load %arg9[%c0_13, %c0_14] : memref<1x128xf32, #tpu.memory_space<vmem>>, vector<1x128xf32>
    %c0_15 = arith.constant 0 : index
    %c0_16 = arith.constant 0 : index
    %c0_17 = arith.constant 0 : index
    %8 = vector.load %arg1[%c0_15, %c0_16, %c0_17] : memref<1x256x3xbf16, #tpu.memory_space<vmem>>, vector<1x256x3xbf16>
    %9 = vector.shape_cast %8 : vector<1x256x3xbf16> to vector<256x3xbf16>
    %10 = vector.extract_strided_slice %9 {offsets = [0, 0], sizes = [222, 3], strides = [1, 1]} : vector<256x3xbf16> to vector<222x3xbf16>
    %11 = vector.extract_strided_slice %9 {offsets = [1, 0], sizes = [222, 3], strides = [1, 1]} : vector<256x3xbf16> to vector<222x3xbf16>
    %12 = vector.extract_strided_slice %9 {offsets = [2, 0], sizes = [222, 3], strides = [1, 1]} : vector<256x3xbf16> to vector<222x3xbf16>
    %13 = vector.extract_strided_slice %9 {offsets = [16, 0], sizes = [222, 3], strides = [1, 1]} : vector<256x3xbf16> to vector<222x3xbf16>
    %14 = vector.extract_strided_slice %9 {offsets = [17, 0], sizes = [222, 3], strides = [1, 1]} : vector<256x3xbf16> to vector<222x3xbf16>
    %15 = vector.extract_strided_slice %9 {offsets = [18, 0], sizes = [222, 3], strides = [1, 1]} : vector<256x3xbf16> to vector<222x3xbf16>
    %16 = vector.extract_strided_slice %9 {offsets = [32, 0], sizes = [222, 3], strides = [1, 1]} : vector<256x3xbf16> to vector<222x3xbf16>
    %17 = vector.extract_strided_slice %9 {offsets = [33, 0], sizes = [222, 3], strides = [1, 1]} : vector<256x3xbf16> to vector<222x3xbf16>
    %18 = vector.extract_strided_slice %9 {offsets = [34, 0], sizes = [222, 3], strides = [1, 1]} : vector<256x3xbf16> to vector<222x3xbf16>
    %19 = tpu.concatenate %10, %11, %12, %13, %14, %15, %16, %17, %18 in 1 : vector<222x3xbf16>, vector<222x3xbf16>, vector<222x3xbf16>, vector<222x3xbf16>, vector<222x3xbf16>, vector<222x3xbf16>, vector<222x3xbf16>, vector<222x3xbf16>, vector<222x3xbf16> -> vector<222x27xbf16>
    %cst = arith.constant dense<0.000000e+00> : vector<222x10xf32>
    %20 = tpu.matmul %19, %0, %cst {dimension_numbers = #tpu.dot_dimension_numbers<[1], [0], [0], [1], [0, 0, 1, 1], [], []>} : vector<222x27xbf16>, vector<27x10xbf16>, vector<222x10xf32> -> vector<222x10xf32>
    %21 = vector.broadcast %4 : vector<1x10xf32> to vector<222x10xf32>
    %22 = arith.addf %20, %21 : vector<222x10xf32>
    %cst_18 = arith.constant 0.000000e+00 : f32
    %23 = vector.broadcast %cst_18 : f32 to vector<222x10xf32>
    %24 = arith.maximumf %22, %23 : vector<222x10xf32>
    %25 = vector.extract_strided_slice %24 {offsets = [0, 0], sizes = [205, 10], strides = [1, 1]} : vector<222x10xf32> to vector<205x10xf32>
    %26 = vector.extract_strided_slice %24 {offsets = [1, 0], sizes = [205, 10], strides = [1, 1]} : vector<222x10xf32> to vector<205x10xf32>
    %27 = arith.maximumf %25, %26 : vector<205x10xf32>
    %28 = vector.extract_strided_slice %24 {offsets = [16, 0], sizes = [205, 10], strides = [1, 1]} : vector<222x10xf32> to vector<205x10xf32>
    %29 = vector.extract_strided_slice %24 {offsets = [17, 0], sizes = [205, 10], strides = [1, 1]} : vector<222x10xf32> to vector<205x10xf32>
    %30 = arith.maximumf %28, %29 : vector<205x10xf32>
    %31 = arith.maximumf %27, %30 : vector<205x10xf32>
    %c0_19 = arith.constant 0 : index
    %c0_20 = arith.constant 0 : index
    %32 = vector.load %arg11[%c0_19, %c0_20] : memref<205x10xf32, #tpu.memory_space<vmem>>, vector<205x10xf32>
    tpu.vector_store %arg11[%c0_19, %c0_20], %31 {strides = array<i32>} : memref<205x10xf32, #tpu.memory_space<vmem>>, vector<205x10xf32>,
    %c0_21 = arith.constant 0 : index
    %c0_22 = arith.constant 0 : index
    %33 = tpu.strided_load %arg11[%c0_21, %c0_22] {strides = array<i32: 2, 1>} : memref<205x10xf32, #tpu.memory_space<vmem>>, vector<7x10xf32>
    %c0_23 = arith.constant 0 : index
    %c0_24 = arith.constant 0 : index
    %34 = vector.load %arg12[%c0_23, %c0_24] : memref<49x10xf32, #tpu.memory_space<vmem>>, vector<7x10xf32>
    tpu.vector_store %arg12[%c0_23, %c0_24], %33 {strides = array<i32>} : memref<49x10xf32, #tpu.memory_space<vmem>>, vector<7x10xf32>,
    %c32 = arith.constant 32 : index
    %c0_25 = arith.constant 0 : index
    %35 = tpu.strided_load %arg11[%c32, %c0_25] {strides = array<i32: 2, 1>} : memref<205x10xf32, #tpu.memory_space<vmem>>, vector<7x10xf32>
    %c7 = arith.constant 7 : index
    %c0_26 = arith.constant 0 : index
    %36 = vector.load %arg12[%c7, %c0_26] : memref<49x10xf32, #tpu.memory_space<vmem>>, vector<7x10xf32>
    tpu.vector_store %arg12[%c7, %c0_26], %35 {strides = array<i32>} : memref<49x10xf32, #tpu.memory_space<vmem>>, vector<7x10xf32>,
    %c64 = arith.constant 64 : index
    %c0_27 = arith.constant 0 : index
    %37 = tpu.strided_load %arg11[%c64, %c0_27] {strides = array<i32: 2, 1>} : memref<205x10xf32, #tpu.memory_space<vmem>>, vector<7x10xf32>
    %c14 = arith.constant 14 : index
    %c0_28 = arith.constant 0 : index
    %38 = vector.load %arg12[%c14, %c0_28] : memref<49x10xf32, #tpu.memory_space<vmem>>, vector<7x10xf32>
    tpu.vector_store %arg12[%c14, %c0_28], %37 {strides = array<i32>} : memref<49x10xf32, #tpu.memory_space<vmem>>, vector<7x10xf32>,
    %c96 = arith.constant 96 : index
    %c0_29 = arith.constant 0 : index
    %39 = tpu.strided_load %arg11[%c96, %c0_29] {strides = array<i32: 2, 1>} : memref<205x10xf32, #tpu.memory_space<vmem>>, vector<7x10xf32>
    %c21 = arith.constant 21 : index
    %c0_30 = arith.constant 0 : index
    %40 = vector.load %arg12[%c21, %c0_30] : memref<49x10xf32, #tpu.memory_space<vmem>>, vector<7x10xf32>
    tpu.vector_store %arg12[%c21, %c0_30], %39 {strides = array<i32>} : memref<49x10xf32, #tpu.memory_space<vmem>>, vector<7x10xf32>,
    %c128 = arith.constant 128 : index
    %c0_31 = arith.constant 0 : index
    %41 = tpu.strided_load %arg11[%c128, %c0_31] {strides = array<i32: 2, 1>} : memref<205x10xf32, #tpu.memory_space<vmem>>, vector<7x10xf32>
    %c28 = arith.constant 28 : index
    %c0_32 = arith.constant 0 : index
    %42 = vector.load %arg12[%c28, %c0_32] : memref<49x10xf32, #tpu.memory_space<vmem>>, vector<7x10xf32>
    tpu.vector_store %arg12[%c28, %c0_32], %41 {strides = array<i32>} : memref<49x10xf32, #tpu.memory_space<vmem>>, vector<7x10xf32>,
    %c160 = arith.constant 160 : index
    %c0_33 = arith.constant 0 : index
    %43 = tpu.strided_load %arg11[%c160, %c0_33] {strides = array<i32: 2, 1>} : memref<205x10xf32, #tpu.memory_space<vmem>>, vector<7x10xf32>
    %c35 = arith.constant 35 : index
    %c0_34 = arith.constant 0 : index
    %44 = vector.load %arg12[%c35, %c0_34] : memref<49x10xf32, #tpu.memory_space<vmem>>, vector<7x10xf32>
    tpu.vector_store %arg12[%c35, %c0_34], %43 {strides = array<i32>} : memref<49x10xf32, #tpu.memory_space<vmem>>, vector<7x10xf32>,
    %c192 = arith.constant 192 : index
    %c0_35 = arith.constant 0 : index
    %45 = tpu.strided_load %arg11[%c192, %c0_35] {strides = array<i32: 2, 1>} : memref<205x10xf32, #tpu.memory_space<vmem>>, vector<7x10xf32>
    %c42 = arith.constant 42 : index
    %c0_36 = arith.constant 0 : index
    %46 = vector.load %arg12[%c42, %c0_36] : memref<49x10xf32, #tpu.memory_space<vmem>>, vector<7x10xf32>
    tpu.vector_store %arg12[%c42, %c0_36], %45 {strides = array<i32>} : memref<49x10xf32, #tpu.memory_space<vmem>>, vector<7x10xf32>,
    %c0_37 = arith.constant 0 : index
    %c0_38 = arith.constant 0 : index
    %47 = vector.load %arg12[%c0_37, %c0_38] : memref<49x10xf32, #tpu.memory_space<vmem>>, vector<49x10xf32>
    %48 = arith.truncf %47 : vector<49x10xf32> to vector<49x10xbf16>
    %49 = vector.extract_strided_slice %48 {offsets = [0, 0], sizes = [33, 10], strides = [1, 1]} : vector<49x10xbf16> to vector<33x10xbf16>
    %50 = vector.extract_strided_slice %48 {offsets = [1, 0], sizes = [33, 10], strides = [1, 1]} : vector<49x10xbf16> to vector<33x10xbf16>
    %51 = vector.extract_strided_slice %48 {offsets = [2, 0], sizes = [33, 10], strides = [1, 1]} : vector<49x10xbf16> to vector<33x10xbf16>
    %52 = vector.extract_strided_slice %48 {offsets = [7, 0], sizes = [33, 10], strides = [1, 1]} : vector<49x10xbf16> to vector<33x10xbf16>
    %53 = vector.extract_strided_slice %48 {offsets = [8, 0], sizes = [33, 10], strides = [1, 1]} : vector<49x10xbf16> to vector<33x10xbf16>
    %54 = vector.extract_strided_slice %48 {offsets = [9, 0], sizes = [33, 10], strides = [1, 1]} : vector<49x10xbf16> to vector<33x10xbf16>
    %55 = vector.extract_strided_slice %48 {offsets = [14, 0], sizes = [33, 10], strides = [1, 1]} : vector<49x10xbf16> to vector<33x10xbf16>
    %56 = vector.extract_strided_slice %48 {offsets = [15, 0], sizes = [33, 10], strides = [1, 1]} : vector<49x10xbf16> to vector<33x10xbf16>
    %57 = vector.extract_strided_slice %48 {offsets = [16, 0], sizes = [33, 10], strides = [1, 1]} : vector<49x10xbf16> to vector<33x10xbf16>
    %58 = tpu.concatenate %49, %50, %51, %52, %53, %54, %55, %56, %57 in 1 : vector<33x10xbf16>, vector<33x10xbf16>, vector<33x10xbf16>, vector<33x10xbf16>, vector<33x10xbf16>, vector<33x10xbf16>, vector<33x10xbf16>, vector<33x10xbf16>, vector<33x10xbf16> -> vector<33x90xbf16>
    %cst_39 = arith.constant dense<0.000000e+00> : vector<33x16xf32>
    %59 = tpu.matmul %58, %1, %cst_39 {dimension_numbers = #tpu.dot_dimension_numbers<[1], [0], [0], [1], [0, 0, 1, 1], [], []>} : vector<33x90xbf16>, vector<90x16xbf16>, vector<33x16xf32> -> vector<33x16xf32>
    %60 = vector.broadcast %5 : vector<1x16xf32> to vector<33x16xf32>
    %61 = arith.addf %59, %60 : vector<33x16xf32>
    %cst_40 = arith.constant 0.000000e+00 : f32
    %62 = vector.broadcast %cst_40 : f32 to vector<33x16xf32>
    %63 = arith.maximumf %61, %62 : vector<33x16xf32>
    %64 = arith.truncf %63 : vector<33x16xf32> to vector<33x16xbf16>
    %65 = vector.extract_strided_slice %64 {offsets = [0, 0], sizes = [17, 16], strides = [1, 1]} : vector<33x16xbf16> to vector<17x16xbf16>
    %66 = vector.extract_strided_slice %64 {offsets = [1, 0], sizes = [17, 16], strides = [1, 1]} : vector<33x16xbf16> to vector<17x16xbf16>
    %67 = vector.extract_strided_slice %64 {offsets = [2, 0], sizes = [17, 16], strides = [1, 1]} : vector<33x16xbf16> to vector<17x16xbf16>
    %68 = vector.extract_strided_slice %64 {offsets = [7, 0], sizes = [17, 16], strides = [1, 1]} : vector<33x16xbf16> to vector<17x16xbf16>
    %69 = vector.extract_strided_slice %64 {offsets = [8, 0], sizes = [17, 16], strides = [1, 1]} : vector<33x16xbf16> to vector<17x16xbf16>
    %70 = vector.extract_strided_slice %64 {offsets = [9, 0], sizes = [17, 16], strides = [1, 1]} : vector<33x16xbf16> to vector<17x16xbf16>
    %71 = vector.extract_strided_slice %64 {offsets = [14, 0], sizes = [17, 16], strides = [1, 1]} : vector<33x16xbf16> to vector<17x16xbf16>
    %72 = vector.extract_strided_slice %64 {offsets = [15, 0], sizes = [17, 16], strides = [1, 1]} : vector<33x16xbf16> to vector<17x16xbf16>
    %73 = vector.extract_strided_slice %64 {offsets = [16, 0], sizes = [17, 16], strides = [1, 1]} : vector<33x16xbf16> to vector<17x16xbf16>
    %74 = tpu.concatenate %65, %66, %67, %68, %69, %70, %71, %72, %73 in 1 : vector<17x16xbf16>, vector<17x16xbf16>, vector<17x16xbf16>, vector<17x16xbf16>, vector<17x16xbf16>, vector<17x16xbf16>, vector<17x16xbf16>, vector<17x16xbf16>, vector<17x16xbf16> -> vector<17x144xbf16>
    %cst_41 = arith.constant dense<0.000000e+00> : vector<17x32xf32>
    %75 = tpu.matmul %74, %2, %cst_41 {dimension_numbers = #tpu.dot_dimension_numbers<[1], [0], [0], [1], [0, 0, 1, 1], [], []>} : vector<17x144xbf16>, vector<144x32xbf16>, vector<17x32xf32> -> vector<17x32xf32>
    %76 = vector.broadcast %6 : vector<1x32xf32> to vector<17x32xf32>
    %77 = arith.addf %75, %76 : vector<17x32xf32>
    %cst_42 = arith.constant 0.000000e+00 : f32
    %78 = vector.broadcast %cst_42 : f32 to vector<17x32xf32>
    %79 = arith.maximumf %77, %78 : vector<17x32xf32>
    %80 = arith.truncf %79 : vector<17x32xf32> to vector<17x32xbf16>
    %cst_43 = arith.constant dense<0.000000e+00> : vector<17x128xf32>
    %81 = tpu.matmul %80, %3, %cst_43 {dimension_numbers = #tpu.dot_dimension_numbers<[1], [0], [0], [1], [0, 0, 1, 1], [], []>} : vector<17x32xbf16>, vector<32x128xbf16>, vector<17x128xf32> -> vector<17x128xf32>
    %82 = vector.broadcast %7 : vector<1x128xf32> to vector<17x128xf32>
    %83 = arith.addf %81, %82 : vector<17x128xf32>
    %84 = vector.extract_strided_slice %83 {offsets = [0, 0], sizes = [3, 128], strides = [1, 1]} : vector<17x128xf32> to vector<3x128xf32>
    %c0_44 = arith.constant 0 : index
    %c0_45 = arith.constant 0 : index
    %c0_46 = arith.constant 0 : index
    %85 = vector.load %arg10[%c0_44, %c0_45, %c0_46] : memref<1x9x128xf32, #tpu.memory_space<vmem>>, vector<1x3x128xf32>
    %86 = vector.shape_cast %85 : vector<1x3x128xf32> to vector<3x128xf32>
    %87 = vector.shape_cast %84 : vector<3x128xf32> to vector<1x3x128xf32>
    tpu.vector_store %arg10[%c0_44, %c0_45, %c0_46], %87 {strides = array<i32>} : memref<1x9x128xf32, #tpu.memory_space<vmem>>, vector<1x3x128xf32>,
    %88 = vector.extract_strided_slice %83 {offsets = [7, 0], sizes = [3, 128], strides = [1, 1]} : vector<17x128xf32> to vector<3x128xf32>
    %c0_47 = arith.constant 0 : index
    %c3 = arith.constant 3 : index
    %c0_48 = arith.constant 0 : index
    %89 = vector.load %arg10[%c0_47, %c3, %c0_48] : memref<1x9x128xf32, #tpu.memory_space<vmem>>, vector<1x3x128xf32>
    %90 = vector.shape_cast %89 : vector<1x3x128xf32> to vector<3x128xf32>
    %91 = vector.shape_cast %88 : vector<3x128xf32> to vector<1x3x128xf32>
    tpu.vector_store %arg10[%c0_47, %c3, %c0_48], %91 {strides = array<i32>} : memref<1x9x128xf32, #tpu.memory_space<vmem>>, vector<1x3x128xf32>,
    %92 = vector.extract_strided_slice %83 {offsets = [14, 0], sizes = [3, 128], strides = [1, 1]} : vector<17x128xf32> to vector<3x128xf32>
    %c0_49 = arith.constant 0 : index
    %c6 = arith.constant 6 : index
    %c0_50 = arith.constant 0 : index
    %93 = vector.load %arg10[%c0_49, %c6, %c0_50] : memref<1x9x128xf32, #tpu.memory_space<vmem>>, vector<1x3x128xf32>
    %94 = vector.shape_cast %93 : vector<1x3x128xf32> to vector<3x128xf32>
    %95 = vector.shape_cast %92 : vector<3x128xf32> to vector<1x3x128xf32>
    tpu.vector_store %arg10[%c0_49, %c6, %c0_50], %95 {strides = array<i32>} : memref<1x9x128xf32, #tpu.memory_space<vmem>>, vector<1x3x128xf32>,
    return
  }
  func.func @transform_0(%arg0: i32) -> (i32, i32, i32) {
    %c0_i32 = arith.constant 0 : i32
    %c0_i32_0 = arith.constant 0 : i32
    %c0_i32_1 = arith.constant 0 : i32
    return %arg0, %c0_i32, %c0_i32_0 : i32, i32, i32
  }
  func.func @transform_1(%arg0: i32) -> (i32, i32) {
    %c0_i32 = arith.constant 0 : i32
    %c0_i32_0 = arith.constant 0 : i32
    %c0_i32_1 = arith.constant 0 : i32
    return %c0_i32, %c0_i32_0 : i32, i32
  }
  func.func @transform_2(%arg0: i32) -> (i32, i32) {
    %c0_i32 = arith.constant 0 : i32
    %c0_i32_0 = arith.constant 0 : i32
    %c0_i32_1 = arith.constant 0 : i32
    return %c0_i32, %c0_i32_0 : i32, i32
  }
  func.func @transform_3(%arg0: i32) -> (i32, i32) {
    %c0_i32 = arith.constant 0 : i32
    %c0_i32_0 = arith.constant 0 : i32
    %c0_i32_1 = arith.constant 0 : i32
    return %c0_i32, %c0_i32_0 : i32, i32
  }
  func.func @transform_4(%arg0: i32) -> (i32, i32) {
    %c0_i32 = arith.constant 0 : i32
    %c0_i32_0 = arith.constant 0 : i32
    %c0_i32_1 = arith.constant 0 : i32
    return %c0_i32, %c0_i32_0 : i32, i32
  }
  func.func @transform_5(%arg0: i32) -> (i32, i32) {
    %c0_i32 = arith.constant 0 : i32
    %c0_i32_0 = arith.constant 0 : i32
    %c0_i32_1 = arith.constant 0 : i32
    return %c0_i32, %c0_i32_0 : i32, i32
  }
  func.func @transform_6(%arg0: i32) -> (i32, i32) {
    %c0_i32 = arith.constant 0 : i32
    %c0_i32_0 = arith.constant 0 : i32
    %c0_i32_1 = arith.constant 0 : i32
    return %c0_i32, %c0_i32_0 : i32, i32
  }
  func.func @transform_7(%arg0: i32) -> (i32, i32) {
    %c0_i32 = arith.constant 0 : i32
    %c0_i32_0 = arith.constant 0 : i32
    %c0_i32_1 = arith.constant 0 : i32
    return %c0_i32, %c0_i32_0 : i32, i32
  }
  func.func @transform_8(%arg0: i32) -> (i32, i32) {
    %c0_i32 = arith.constant 0 : i32
    %c0_i32_0 = arith.constant 0 : i32
    %c0_i32_1 = arith.constant 0 : i32
    return %c0_i32, %c0_i32_0 : i32, i32
  }
  func.func @transform_9(%arg0: i32) -> (i32, i32, i32) {
    %c0_i32 = arith.constant 0 : i32
    %c0_i32_0 = arith.constant 0 : i32
    %c0_i32_1 = arith.constant 0 : i32
    return %arg0, %c0_i32, %c0_i32_0 : i32, i32, i32
  }
}

</mosaic_0001>

<bundles_post_ra>
// kernel: pnet_forward.1
= control target key start
LH: loop header
LB: loop body
LE: loop exit
PB: predicated region body
PF: predicated region fallthrough
CT: control target
= control target key end

     0   :  { %s2438_s30 = smov 0   ;;  %s3409_s0 = inlined_call_operand.vmem [shape: bf16[2,256,3], index: 0, kind: input, shape index: {}]   ;;  %s3410_s1 = inlined_call_operand.vmem [shape: bf16[27,10], index: 1, kind: input, shape index: {}]   ;;  %s3411_s2 = inlined_call_operand.vmem [shape: f32[1,10], index: 2, kind: input, shape index: {}]   ;;  %s3412_s3 = inlined_call_operand.vmem [shape: bf16[90,16], index: 3, kind: input, shape index: {}]   ;;  %s3413_s4 = inlined_call_operand.vmem [shape: f32[1,16], index: 4, kind: input, shape index: {}]   ;;  %s3414_s5 = inlined_call_operand.vmem [shape: bf16[144,32], index: 5, kind: input, shape index: {}]   ;;  %s3415_s6 = inlined_call_operand.vmem [shape: f32[1,32], index: 6, kind: input, shape index: {}]   ;;  %s3416_s7 = inlined_call_operand.vmem [shape: bf16[32,128], index: 7, kind: input, shape index: {}]   ;;  %s3417_s8 = inlined_call_operand.vmem [shape: f32[1,128], index: 8, kind: input, shape index: {}]   ;;  %s3418_s9 = inlined_call_operand.vmem [shape: f32[2,9,128], index: 9, kind: output, shape index: {}]  }
   0x1 LB: > { %s2107_s10 = sadd.s32 4294967295, %s2363_s30   ;;  %p2111_p0 = scmp.ge.s32.totalorder %s2363_s30, 1  ;;  %s2363_s30 = sphi %s2438_s30, %s19_s30  }
   0x2   : > { %p287_p1 = scmp.lt.s32.totalorder %s2363_s30, 3 }
   0x4   : > { %p288_p2 = pnand %p2111_p0, %p287_p1 }
   0x5   : > { %p323_p3 = scmp.lt.s32.totalorder (!%p288_p2), %s2107_s10, 1  ;;  %s2365_s15 = smov (!%p288_p2), 9  }
   0x6   : > { %291 = sbr.rel (%p288_p2) target bundleno = 1304 (0x518), region = 56  ;;  %s2366_s16 = smov (!%p288_p2), 18  }
   0x7   : > { %s2367_s17 = smov (!%p288_p2), 6   ;;  %s2368_s18 = smov (!%p288_p2), 24  }
   0x8   : > { %s2369_s19 = smov (!%p288_p2), 15   ;;  %s2370_s20 = smov (!%p288_p2), 3  }
   0x9   : > { %s2371_s21 = smov (!%p288_p2), 12   ;;  %s2372_s22 = smov (!%p288_p2), 21  }
   0xa   : > { %s2374_s12 = smov (!%p288_p2), 40   ;;  %s2375_s13 = smov (!%p288_p2), 20  }
   0xb   : > { %s3420_s10 = smov (!%p323_p3, %s2107_s10), 1  ;;  %vm618_vm0 = vcmask 1046528   ;;  %vm478_vm1 = vsmask.f32 7424  ;;  %vm1147_vm2 = vcmask 1044480   ;;  %vm1148_vm3 = vcmask 1045504  }
   0xc   : > { %s2279_s11 = sshll.u32 %s3420_s10, 7  ;;  %vm872_vm4 = vcmask 23552   ;;  %vm901_vm5 = vcmask 48128   ;;  %vm930_vm6 = vcmask 72704   ;;  %vm959_vm7 = vcmask 97280   ;;  %s2384_s24 = smov 48  }
   0xd   : > { %s2452_s14 = scalar_lea.vmem %s3409_s0, %s2279_s11  ;;  %vm988_vm8 = vcmask 121856   ;;  %vm1017_vm9 = vcmask 146432   ;;  %vm1046_vm10 = vcmask 171008   ;;  %vm1075_vm11 = vcmask 195584   ;;  %s2385_s27 = smov 16  }
   0xe   : > { %v2455_v0 = vld [vmem:[%s2452_s14 + $0x8] sm:$0xff]  ;;  %v2458_v1 = vld [vmem:[%s2452_s14] sm:$0xff]  ;;  %v2461_v2 = vld [vmem:[%s2452_s14 + $0x10] sm:$0xff]  ;;  %vm1118_vm12 = vcmask 220160   ;;  %vm1429_vm13 = vcmask 80896   ;;  %vm1458_vm14 = vcmask 79872  }
   0xf   : > { %v2464_v3 = vld [vmem:[%s2452_s14 + $0x18] sm:$0xff]  ;;  %679 = vrot.lane.b32.xlu1 %v2455_v0, %s2365_s15  ;;  %v619_v4 = vrot.slane %v2458_v1, 1  ;;  %v620_v5 = vrot.slane %v2455_v0, 1  ;;  %v622_v6 = vrot.slane %v2461_v2, 1  ;;  %778 = vrot.lane.b32.xlu2 %v2461_v2, %s2366_s16  ;;  %v480_v8 = vshrl.u32 %v2458_v1, 16  ;;  %v2495_v28 = vld [vmem:[%s2452_s14 + $0x20] sm:$0xff] }
  0x10   : > { %v624_v7 = vrot.slane %v2464_v3, 1  ;;  %v482_v9 = vshll.u32 %v2458_v1, 16  ;;  %v487_v10 = vshll.u32 %v2455_v0, 16  ;;  %v495_v14 = vshll.u32 %v2461_v2, 16  ;;  %v2518_v36 = vld [vmem:[%s2452_s14 + $0x28] sm:$0xff]  ;;  %v2537_v43 = vld [vmem:[%s2452_s14 + $0x50] sm:$0xff] }
  0x11   : > { %v621_v11 = vsel %vm618_vm0, %v619_v4, %v620_v5  ;;  %v491_v17 = vshrl.u32 %v2455_v0, 16  ;;  %v623_v18 = vsel %vm618_vm0, %v620_v5, %v622_v6  ;;  %v499_v21 = vshrl.u32 %v2461_v2, 16  ;;  %v2527_v39 = vld [vmem:[%s2452_s14 + $0x48] sm:$0xff]  ;;  %v2563_v54 = vld [vmem:[%s2452_s14 + $0x58] sm:$0xff]  ;;  %v2583_v62 = vld [vmem:[%s2452_s14 + $0x60] sm:$0xff]  ;;  %s2386_s11 = smov 96  }
  0x12   : > { %646 = vrot.lane.b32.xlu0 %v621_v11, %s2367_s17  ;;  %v484_v12 = vrot.slane %v482_v9, 1  ;;  %v489_v13 = vrot.slane %v487_v10, 1  ;;  %v625_v15 = vsel %vm618_vm0, %v622_v6, %v624_v7  ;;  %v497_v20 = vrot.slane %v495_v14, 1  ;;  %v2589_v4 = vld [vmem:[%s2452_s14 + $0x30] sm:$0xff]  ;;  %v2602_v9 = vld [vmem:[%s2452_s14 + $0x38] sm:$0xff]  ;;  %s2280_s29 = sshll.u32 %s3420_s10, 4 }
  0x13   : > { %v503_v22 = vshll.u32 %v2464_v3, 16  ;;  %v507_v29 = vshrl.u32 %v2464_v3, 16  ;;  %v511_v30 = vshll.u32 %v2495_v28, 16  ;;  %v626_v34 = vrot.slane %v2495_v28, 1 }
  0x14   : > { %v485_v16 = vor.u32 %v484_v12, %v480_v8  ;;  %v493_v23 = vor.u32 %v491_v17, %v489_v13  ;;  %v501_v24 = vor.u32 %v499_v21, %v497_v20  ;;  %v515_v37 = vshrl.u32 %v2495_v28, 16  ;;  %v2634_v21 = vld [vmem:[%s2452_s14 + $0x40] sm:$0xff] }
  0x15   : > { %v505_v25 = vrot.slane %v503_v22, 1  ;;  %v513_v32 = vrot.slane %v511_v30, 1  ;;  %v2514_v35 = vsel %vm618_vm0, %v624_v7, %v626_v34  ;;  %v519_v38 = vshll.u32 %v2518_v36, 16 }
  0x16   : > { %v490_v19 = vsel %vm478_vm1, %v485_v16, %v489_v13  ;;  %v498_v26 = vsel %vm478_vm1, %v493_v23, %v497_v20  ;;  %v628_v42 = vrot.slane %v2518_v36, 1  ;;  %v551_v44 = vshll.u32 %v2527_v39, 16 }
  0x17   : > { %844 = vrot.lane.b32.xlu1 %v625_v15, %s2368_s18  ;;  %745 = vrot.lane.b32.xlu2 %v623_v18, %s2369_s19  ;;  %v506_v27 = vsel %vm478_vm1, %v501_v24, %v505_v25  ;;  %v509_v31 = vor.u32 %v507_v29, %v505_v25  ;;  %v517_v40 = vor.u32 %v515_v37, %v513_v32  ;;  %v2531_v41 = vrot.slane %v519_v38, 1 }
  0x18   : > { %v2547_v46 = vsel %vm618_vm0, %v626_v34, %v628_v42  ;;  %v2551_v47 = vrot.slane %v551_v44, 1  ;;  %v555_v48 = vshrl.u32 %v2527_v39, 16  ;;  %v559_v49 = vshll.u32 %v2537_v43, 16  ;;  %v2281_v44 = vld [vmem:[%s3410_s1] sm:$0xff] }
  0x19   : > { %v2504_v33 = vsel %vm478_vm1, %v509_v31, %v513_v32  ;;  %v2542_v45 = vsel %vm478_vm1, %v517_v40, %v2531_v41  ;;  %v636_v50 = vrot.slane %v2527_v39, 1  ;;  %v638_v51 = vrot.slane %v2537_v43, 1 }
  0x1a   : > { %590 = vrot.lane.b32.xlu0 %v490_v19, %s2370_s20  ;;  %v557_v52 = vor.u32 %v555_v48, %v2551_v47  ;;  %v561_v53 = vrot.slane %v559_v49, 1  ;;  %v563_v57 = vshrl.u32 %v2537_v43, 16  ;;  %v567_v58 = vshll.u32 %v2563_v54, 16 }
  0x1b   : > { %v2568_v55 = vsel %vm618_vm0, %v636_v50, %v638_v51  ;;  %v640_v59 = vrot.slane %v2563_v54, 1  ;;  %v571_v6 = vshrl.u32 %v2563_v54, 16  ;;  %v575_v7 = vshll.u32 %v2583_v62, 16 }
  0x1c   : > { %v2573_v56 = vsel %vm478_vm1, %v557_v52, %v561_v53  ;;  %v565_v60 = vor.u32 %v563_v57, %v561_v53  ;;  %v569_v61 = vrot.slane %v567_v58, 1  ;;  %v642_v8 = vrot.slane %v2583_v62, 1 }
  0x1d   : > { %v2586_v63 = vsel %vm618_vm0, %v638_v51, %v640_v59  ;;  %v527_v10 = vshll.u32 %v2589_v4, 16  ;;  %v2607_v12 = vrot.slane %v575_v7, 1  ;;  %v535_v16 = vshll.u32 %v2602_v9, 16 }
  0x1e   : > { %v2594_v5 = vsel %vm478_vm1, %v565_v60, %v569_v61  ;;  %v573_v11 = vor.u32 %v571_v6, %v569_v61  ;;  %v2612_v13 = vsel %vm618_vm0, %v640_v59, %v642_v8  ;;  %v630_v23 = vrot.slane %v2589_v4, 1 }
  0x1f   : > { %715 = vrot.lane.b32.xlu1 %v498_v26, %s2371_s21  ;;  %592 = vrot.lane.b32.xlu2 %v498_v26, %s2370_s20  ;;  %v529_v14 = vrot.slane %v527_v10, 1  ;;  %v537_v19 = vrot.slane %v535_v16, 1  ;;  %v632_v24 = vrot.slane %v2602_v9, 1  ;;  %v539_v25 = vshrl.u32 %v2602_v9, 16  ;;  %v2186_v26 = vld [vmem:[%s3410_s1 + $0x8] sm:$0xf] }
  0x20   : > { %v2620_v17 = vsel %vm478_vm1, %v573_v11, %v2607_v12  ;;  %v543_v29 = vshll.u32 %v2634_v21, 16  ;;  %v2373_v31 = vmov 65535   ;;  %v523_v49 = vshrl.u32 %v2518_v36, 16 }
  0x21   : > { %v1149_v32 = vsel %vm1147_vm2, 4294967295, %v2373_v31  ;;  %v541_v37 = vor.u32 %v539_v25, %v537_v19  ;;  %v634_v53 = vrot.slane %v2634_v21, 1  ;;  %v547_v58 = vshrl.u32 %v2634_v21, 16 }
  0x22   : > { %814 = vrot.lane.b32.xlu0 %v506_v27, %s2372_s22  ;;  %v545_v38 = vrot.slane %v543_v29, 1  ;;  %v525_v51 = vor.u32 %v523_v49, %v2531_v41  ;;  %v2697_v10 = vsel %vm618_vm0, %v628_v42, %v630_v23  ;;  %vm1455_vm15 = vcmask 77824  }
  0x23   : > { %v2682_v59 = vsel %vm618_vm0, %v632_v24, %v634_v53 }
  0x24   : > { %v2664_v48 = vsel %vm478_vm1, %v541_v37, %v545_v38  ;;  %v2676_v57 = vsel %vm478_vm1, %v525_v51, %v529_v14  ;;  %v549_v41 = vor.u32 %v547_v58, %v545_v38 }
  0x26   : > { %v2690_v7 = vsel %vm478_vm1, %v549_v41, %v2551_v47 }
  0x27   : > { %681 = vrot.lane.b32.xlu1 %v2461_v2, %s2365_s15  ;;  %717 = vrot.lane.b32.xlu2 %v506_v27, %s2371_s21 }
  0x2a   : > { %648 = vrot.lane.b32.xlu0 %v623_v18, %s2367_s17 }
  0x2f   : > { %780 = vrot.lane.b32.xlu1 %v2464_v3, %s2366_s16  ;;  %816 = vrot.lane.b32.xlu2 %v2504_v33, %s2372_s22 }
  0x32   : > { %747 = vrot.lane.b32.xlu0 %v625_v15, %s2369_s19 }
  0x37   : > { %594 = vrot.lane.b32.xlu1 %v506_v27, %s2370_s20  ;;  %650 = vrot.lane.b32.xlu2 %v625_v15, %s2367_s17  ;;  %v531_v15 = vshrl.u32 %v2589_v4, 16  ;;  %v2282_v27 = vld [vmem:[%s3410_s1 + $0x8] sm:$0x30] }
  0x38   : > { %v2187_v30 = vor.u32 %v2282_v27, %v2186_v26 }
  0x39   : > { %v533_v18 = vor.u32 %v531_v15, %v529_v14  ;;  %v2706_v15 = vsel %vm618_vm0, %v634_v53, %v636_v50 }
  0x3a   : > { %846 = vrot.lane.b32.xlu0 %v2514_v35, %s2368_s18 }
  0x3b   : > { %v2627_v20 = vsel %vm478_vm1, %v533_v18, %v537_v19 }
  0x3f   : > { %719 = vrot.lane.b32.xlu1 %v2504_v33, %s2371_s21  ;;  %749 = vrot.lane.b32.xlu2 %v2514_v35, %s2369_s19 }
  0x42   : > { %683 = vrot.lane.b32.xlu0 %v2464_v3, %s2365_s15 }
  0x47   : > { %818 = vrot.lane.b32.xlu1 %v2542_v45, %s2372_s22  ;;  %848 = vrot.lane.b32.xlu2 %v2547_v46, %s2368_s18 }
  0x4a   : > { %782 = vrot.lane.b32.xlu0 %v2495_v28, %s2366_s16 }
  0x4f   : > { %664 = vrot.lane.b32.xlu1 %v2568_v55, %s2367_s17  ;;  %697 = vrot.lane.b32.xlu2 %v2537_v43, %s2365_s15 }
  0x52   : > { %608 = vrot.lane.b32.xlu0 %v2573_v56, %s2370_s20 }
  0x57   : > { %763 = vrot.lane.b32.xlu1 %v2586_v63, %s2369_s19  ;;  %796 = vrot.lane.b32.xlu2 %v2563_v54, %s2366_s16 }
  0x5a   : > { %733 = vrot.lane.b32.xlu0 %v2594_v5, %s2371_s21 }
  0x5f   : > { %862 = vrot.lane.b32.xlu1 %v2612_v13, %s2368_s18  ;;  %596 = vrot.lane.b32.xlu2 %v2504_v33, %s2370_s20  ;;  %v1150_v33 = vsel %vm1148_vm3, %v1149_v32, 0  ;;  %vm1544_vm3 = vsmask.f32 4352 }
  0x60   : > { %v1152_v34 = vand.u32 %v2187_v30, %v1150_v33  ;;  %v579_v30 = vshrl.u32 %v2583_v62, 16 }
  0x62   : > { %832 = vrot.lane.b32.xlu0 %v2620_v17, %s2372_s22  ;;  %1160 = vmatpush.bf16.msra.mxu0 %v1152_v34 }
  0x63   : > { %2317 = vmatpush.bf16.msra.mxu2 %v1152_v34  ;;  %2316 = vmatpush.bf16.msra.mxu1 %v1152_v34 }
  0x64   : > { %2318 = vmatpush.bf16.msra.mxu3 %v1152_v34  ;;  %v581_v34 = vor.u32 %v579_v30, %v2607_v12 }
  0x66   : > { %1161 = vmatpush.bf16.msra.mxu0 %v2281_v44 }
  0x67   : > { %602 = vrot.lane.b32.xlu1 %v2627_v20, %s2370_s20  ;;  %685 = vrot.lane.b32.xlu2 %v2495_v28, %s2365_s15 }
  0x68   : > { %2320 = vmatpush.bf16.msra.mxu2 %v2281_v44  ;;  %2319 = vmatpush.bf16.msra.mxu1 %v2281_v44 }
  0x69   : > { %v2636_v22 = vpop.permute.xlu2 %778  ;;  %2321 = vmatpush.bf16.msra.mxu3 %v2281_v44 }
  0x6a   : > { %652 = vrot.lane.b32.xlu0 %v2514_v35, %s2367_s17  ;;  %v2654_v35 = vsel %vm618_vm0, %v630_v23, %v632_v24  ;;  %v2721_v24 = vld [vmem:[%s2452_s14 + $0x68] sm:$0xff] }
  0x6b   : > { %v583_v31 = vshll.u32 %v2721_v24, 16  ;;  %v2733_v32 = vrot.slane %v2721_v24, 1 }
  0x6d   : > { %v2740_v37 = vrot.slane %v583_v31, 1  ;;  %v2748_v44 = vsel %vm618_vm0, %v642_v8, %v2733_v32 }
  0x6f   : > { %721 = vrot.lane.b32.xlu1 %v2542_v45, %s2371_s21  ;;  %691 = vrot.lane.b32.xlu2 %v2602_v9, %s2365_s15  ;;  %v2755_v12 = vsel %vm478_vm1, %v581_v34, %v2740_v37 }
  0x71   : > { %v746_v40 = vpop.permute.xlu2 %745 }
  0x72   : > { %658 = vrot.lane.b32.xlu0 %v2654_v35, %s2367_s17 }
  0x77   : > { %727 = vrot.lane.b32.xlu1 %v2664_v48, %s2371_s21  ;;  %784 = vrot.lane.b32.xlu2 %v2518_v36, %s2366_s16 }
  0x79   : > { %v593_v52 = vpop.permute.xlu2 %592 }
  0x7a   : > { %751 = vrot.lane.b32.xlu0 %v2547_v46, %s2369_s19  ;;  %v876_v38 = vsel %vm872_vm4, %v2455_v0, %v593_v52 }
  0x7f   : > { %820 = vrot.lane.b32.xlu1 %v2676_v57, %s2372_s22  ;;  %790 = vrot.lane.b32.xlu2 %v2634_v21, %s2366_s16 }
  0x81   : > { %v680_v60 = vpop.permute.xlu1 %679  ;;  %v718_v61 = vpop.permute.xlu2 %717 }
  0x82   : > { %757 = vrot.lane.b32.xlu0 %v2682_v59, %s2369_s19 }
  0x84   : > { %v647_v6 = vpop.permute.xlu0 %646 }
  0x87   : > { %610 = vrot.lane.b32.xlu1 %v2594_v5, %s2370_s20  ;;  %826 = vrot.lane.b32.xlu2 %v2690_v7, %s2372_s22 }
  0x89   : > { %v845_v11 = vpop.permute.xlu1 %844  ;;  %v817_v14 = vpop.permute.xlu2 %816 }
  0x8a   : > { %850 = vrot.lane.b32.xlu0 %v2697_v10, %s2368_s18 }
  0x8c   : > { %v591_v47 = vpop.permute.xlu0 %590 }
  0x8d   : > { %v874_v42 = vsel %vm872_vm4, %v2458_v1, %v591_v47 }
  0x8e   : > { %v903_v16 = vsel %vm901_vm5, %v874_v42, %v647_v6 }
  0x8f   : > { %856 = vrot.lane.b32.xlu1 %v2706_v15, %s2368_s18  ;;  %699 = vrot.lane.b32.xlu2 %v2563_v54, %s2365_s15  ;;  %v932_v19 = vsel %vm930_vm6, %v903_v16, %v680_v60 }
  0x91   : > { %v716_v18 = vpop.permute.xlu1 %715  ;;  %v651_v50 = vpop.permute.xlu2 %650 }
  0x92   : > { %v961_v23 = vsel %vm959_vm7, %v932_v19, %v716_v18  ;;  %666 = vrot.lane.b32.xlu0 %v2586_v63, %s2367_s17 }
  0x93   : > { %v990_v1 = vsel %vm988_vm8, %v961_v23, %v746_v40 }
  0x94   : > { %v1019_v25 = vsel %vm1017_vm9, %v990_v1, %v2636_v22  ;;  %v815_v26 = vpop.permute.xlu0 %814 }
  0x95   : > { %v1048_v27 = vsel %vm1046_vm10, %v1019_v25, %v815_v26 }
  0x96   : > { %v1077_v29 = vsel %vm1075_vm11, %v1048_v27, %v845_v11 }
  0x97   : > { %765 = vrot.lane.b32.xlu1 %v2612_v13, %s2369_s19  ;;  %2188 = vmatmul.msk.bf16.vlgmr.msra.gmra.mxu0 %vm1118_vm12, %v1077_v29 }
  0x98   : > { %798 = vrot.lane.b32.xlu2 %v2583_v62, %s2366_s16 }
  0x99   : > { %v682_v22 = vpop.permute.xlu1 %681  ;;  %v750_v33 = vpop.permute.xlu2 %749 }
  0x9a   : > { %735 = vrot.lane.b32.xlu0 %v2620_v17, %s2371_s21 }
  0x9c   : > { %v649_v40 = vpop.permute.xlu0 %648 }
  0x9d   : > { %v905_v49 = vsel %vm901_vm5, %v876_v38, %v649_v40 }
  0x9e   : > { %v934_v52 = vsel %vm930_vm6, %v905_v49, %v682_v22 }
  0x9f   : > { %864 = vrot.lane.b32.xlu1 %v2748_v44, %s2368_s18  ;;  %v963_v53 = vsel %vm959_vm7, %v934_v52, %v718_v61 }
  0xa0   : > { %598 = vrot.lane.b32.xlu2 %v2542_v45, %s2370_s20 }
  0xa1   : > { %v781_v0 = vpop.permute.xlu1 %780  ;;  %v849_v51 = vpop.permute.xlu2 %848 }
  0xa2   : > { %834 = vrot.lane.b32.xlu0 %v2755_v12, %s2372_s22 }
  0xa4   : > { %v748_v8 = vpop.permute.xlu0 %747 }
  0xa5   : > { %v992_v58 = vsel %vm988_vm8, %v963_v53, %v748_v8  ;;  %v2823_v8 = vld [vmem:[%s2452_s14 + $0x70] sm:$0xff] }
  0xa6   : > { %v1021_v45 = vsel %vm1017_vm9, %v992_v58, %v781_v0 }
  0xa7   : > { %604 = vrot.lane.b32.xlu1 %v2664_v48, %s2370_s20  ;;  %v1050_v11 = vsel %vm1046_vm10, %v1021_v45, %v817_v14 }
  0xa8   : > { %687 = vrot.lane.b32.xlu2 %v2518_v36, %s2365_s15 }
  0xa9   : > { %v595_v41 = vpop.permute.xlu1 %594  ;;  %v698_v60 = vpop.permute.xlu2 %697 }
  0xaa   : > { %654 = vrot.lane.b32.xlu0 %v2547_v46, %s2367_s17  ;;  %v878_v47 = vsel %vm872_vm4, %v2461_v2, %v595_v41 }
  0xab   : > { %v907_v46 = vsel %vm901_vm5, %v878_v47, %v651_v50 }
  0xac   : > { %v847_v6 = vpop.permute.xlu0 %846 }
  0xad   : > { %v1079_v61 = vsel %vm1075_vm11, %v1050_v11, %v847_v6  ;;  %v708_v6 = vshll.u32 %v2823_v8, 16 }
  0xae   : > { %2189 = vmatmul.msk.bf16.gmra.mxu0 %vm1118_vm12, %v1079_v61 }
  0xaf   : > { %723 = vrot.lane.b32.xlu1 %v2676_v57, %s2371_s21 }
  0xb0   : > { %693 = vrot.lane.b32.xlu2 %v2634_v21, %s2365_s15 }
  0xb1   : > { %v720_v42 = vpop.permute.xlu1 %719  ;;  %v797_v16 = vpop.permute.xlu2 %796 }
  0xb2   : > { %660 = vrot.lane.b32.xlu0 %v2682_v59, %s2367_s17 }
  0xb4   : > { %v684_v14 = vpop.permute.xlu0 %683 }
  0xb5   : > { %v936_v18 = vsel %vm930_vm6, %v907_v46, %v684_v14 }
  0xb6   : > { %v965_v2 = vsel %vm959_vm7, %v936_v18, %v720_v42  ;;  %v2843_v42 = vrot.slane %v708_v6, 1 }
  0xb7   : > { %729 = vrot.lane.b32.xlu1 %v2690_v7, %s2371_s21  ;;  %v994_v1 = vsel %vm988_vm8, %v965_v2, %v750_v33 }
  0xb8   : > { %786 = vrot.lane.b32.xlu2 %v2589_v4, %s2366_s16 }
  0xb9   : > { %v819_v19 = vpop.permute.xlu1 %818  ;;  %v2789_v23 = vpop.permute.xlu2 %596 }
  0xba   : > { %753 = vrot.lane.b32.xlu0 %v2697_v10, %s2369_s19 }
  0xbc   : > { %v783_v50 = vpop.permute.xlu0 %782 }
  0xbd   : > { %v1023_v25 = vsel %vm1017_vm9, %v994_v1, %v783_v50 }
  0xbe   : > { %v1052_v26 = vsel %vm1046_vm10, %v1023_v25, %v819_v19 }
  0xbf   : > { %822 = vrot.lane.b32.xlu1 %v2627_v20, %s2372_s22  ;;  %v1081_v27 = vsel %vm1075_vm11, %v1052_v26, %v849_v51 }
  0xc0   : > { %2190 = vmatmul.msk.bf16.gmra.mxu0 %vm1118_vm12, %v1081_v27  ;;  %792 = vrot.lane.b32.xlu2 %v2527_v39, %s2366_s16 }
  0xc1   : > { %v665_v29 = vpop.permute.xlu1 %664  ;;  %v686_v30 = vpop.permute.xlu2 %685 }
  0xc2   : > { %759 = vrot.lane.b32.xlu0 %v2706_v15, %s2369_s19 }
  0xc4   : > { %v609_v31 = vpop.permute.xlu0 %608 }
  0xc5   : > { %v892_v22 = vsel %vm872_vm4, %v2527_v39, %v609_v31 }
  0xc6   : > { %v921_v38 = vsel %vm901_vm5, %v892_v22, %v665_v29 }
  0xc7   : > { %612 = vrot.lane.b32.xlu1 %v2620_v17, %s2370_s20  ;;  %v950_v49 = vsel %vm930_vm6, %v921_v38, %v698_v60  ;;  %v587_v60 = vshrl.u32 %v2721_v24, 16 }
  0xc8   : > { %828 = vrot.lane.b32.xlu2 %v2573_v56, %s2372_s22 }
  0xc9   : > { %v764_v33 = vpop.permute.xlu1 %763  ;;  %v692_v34 = vpop.permute.xlu2 %691  ;;  %v2841_v47 = vor.u32 %v587_v60, %v2740_v37 }
  0xca   : > { %852 = vrot.lane.b32.xlu0 %v2654_v35, %s2368_s18 }
  0xcb   : > { %v2855_v14 = vsel %vm478_vm1, %v2841_v47, %v2843_v42 }
  0xcc   : > { %v734_v40 = vpop.permute.xlu0 %733 }
  0xcd   : > { %v979_v0 = vsel %vm959_vm7, %v950_v49, %v734_v40 }
  0xce   : > { %v1008_v17 = vsel %vm988_vm8, %v979_v0, %v764_v33 }
  0xcf   : > { %858 = vrot.lane.b32.xlu1 %v2568_v55, %s2368_s18  ;;  %v1037_v53 = vsel %vm1017_vm9, %v1008_v17, %v797_v16 }
  0xd0   : > { %701 = vrot.lane.b32.xlu2 %v2583_v62, %s2365_s15 }
  0xd1   : > { %v863_v51 = vpop.permute.xlu1 %862  ;;  %v785_v52 = vpop.permute.xlu2 %784 }
  0xd2   : > { %668 = vrot.lane.b32.xlu0 %v2612_v13, %s2367_s17  ;;  %v2834_v13 = vrot.slane %v2823_v8, 1 }
  0xd4   : > { %v833_v58 = vpop.permute.xlu0 %832  ;;  %v2848_v46 = vsel %vm618_vm0, %v2733_v32, %v2834_v13 }
  0xd5   : > { %v1066_v45 = vsel %vm1046_vm10, %v1037_v53, %v833_v58 }
  0xd6   : > { %v1095_v41 = vsel %vm1075_vm11, %v1066_v45, %v863_v51 }
  0xd7   : > { %767 = vrot.lane.b32.xlu1 %v2748_v44, %s2369_s19  ;;  %2197 = vmatmul.msk.bf16.vlgmr.msra.gmra.mxu2 %vm1118_vm12, %v1095_v41 }
  0xd8   : > { %800 = vrot.lane.b32.xlu2 %v2721_v24, %s2366_s16 }
  0xd9   : > { %v603_v11 = vpop.permute.xlu1 %602  ;;  %v791_v61 = vpop.permute.xlu2 %790 }
  0xda   : > { %737 = vrot.lane.b32.xlu0 %v2755_v12, %s2371_s21  ;;  %v886_v26 = vsel %vm872_vm4, %v2589_v4, %v603_v11  ;;  %v712_v11 = vshrl.u32 %v2823_v8, 16 }
  0xdc   : > { %v653_v16 = vpop.permute.xlu0 %652 }
  0xdf   : > { %866 = vrot.lane.b32.xlu1 %v2848_v46, %s2368_s18 }
  0xe0   : > { %600 = vrot.lane.b32.xlu2 %v2676_v57, %s2370_s20  ;;  %v880_v57 = vsel %vm872_vm4, %v2464_v3, %v2789_v23 }
  0xe1   : > { %v722_v37 = vpop.permute.xlu1 %721  ;;  %v827_v18 = vpop.permute.xlu2 %826 }
  0xe2   : > { %836 = vrot.lane.b32.xlu0 %v2855_v14, %s2372_s22 }
  0xe4   : > { %v659_v2 = vpop.permute.xlu0 %658 }
  0xe5   : > { %v915_v29 = vsel %vm901_vm5, %v886_v26, %v659_v2 }
  0xe7   : > { %606 = vrot.lane.b32.xlu1 %v2690_v7, %s2370_s20 }
  0xe8   : > { %689 = vrot.lane.b32.xlu2 %v2589_v4, %s2365_s15 }
  0xe9   : > { %v728_v19 = vpop.permute.xlu1 %727  ;;  %v700_v1 = vpop.permute.xlu2 %699 }
  0xea   : > { %656 = vrot.lane.b32.xlu0 %v2697_v10, %s2367_s17  ;;  %v909_v10 = vsel %vm901_vm5, %v880_v57, %v653_v16 }
  0xec   : > { %v752_v50 = vpop.permute.xlu0 %751 }
  0xef   : > { %725 = vrot.lane.b32.xlu1 %v2627_v20, %s2371_s21  ;;  %v938_v20 = vsel %vm930_vm6, %v909_v10, %v686_v30  ;;  %v2963_v10 = vld [vmem:[%s3411_s2] ss:$0 sm:$0xff] }
  0xf0   : > { %695 = vrot.lane.b32.xlu2 %v2527_v39, %s2365_s15  ;;  %v967_v3 = vsel %vm959_vm7, %v938_v20, %v722_v37 }
  0xf1   : > { %v821_v7 = vpop.permute.xlu1 %820  ;;  %v996_v39 = vsel %vm988_vm8, %v967_v3, %v752_v50 }
  0xf2   : > { %662 = vrot.lane.b32.xlu0 %v2706_v15, %s2367_s17  ;;  %v799_v25 = vpop.permute.xlu2 %798  ;;  %v944_v15 = vsel %vm930_vm6, %v915_v29, %v692_v34  ;;  %v1025_v31 = vsel %vm1017_vm9, %v996_v39, %v785_v52 }
  0xf3   : > { %v973_v23 = vsel %vm959_vm7, %v944_v15, %v728_v19 }
  0xf4   : > { %v758_v27 = vpop.permute.xlu0 %757 }
  0xf5   : > { %v1002_v22 = vsel %vm988_vm8, %v973_v23, %v758_v27 }
  0xf6   : > { %v1031_v40 = vsel %vm1017_vm9, %v1002_v22, %v791_v61 }
  0xf7   : > { %731 = vrot.lane.b32.xlu1 %v2573_v56, %s2371_s21  ;;  %v1054_v56 = vsel %vm1046_vm10, %v1025_v31, %v821_v7 }
  0xf8   : > { %788 = vrot.lane.b32.xlu2 %v2602_v9, %s2366_s16 }
  0xf9   : > { %v611_v4 = vpop.permute.xlu1 %610 }
  0xfa   : > { %755 = vrot.lane.b32.xlu0 %v2654_v35, %s2369_s19  ;;  %v2891_v30 = vpop.permute.xlu2 %598  ;;  %v1060_v35 = vsel %vm1046_vm10, %v1031_v40, %v827_v18  ;;  %v714_v18 = vor.u32 %v712_v11, %v2843_v42 }
  0xfb   : > { %v882_v3 = vsel %vm872_vm4, %v2495_v28, %v2891_v30 }
  0xfc   : > { %v851_v33 = vpop.permute.xlu0 %850 }
  0xfd   : > { %v1083_v38 = vsel %vm1075_vm11, %v1054_v56, %v851_v33 }
  0xfe   : > { %2191 = vmatmul.msk.bf16.gmra.mxu0 %vm1118_vm12, %v1083_v38 }
  0xff   : > { %824 = vrot.lane.b32.xlu1 %v2664_v48, %s2372_s22  ;;  %v894_v48 = vsel %vm872_vm4, %v2537_v43, %v611_v4 }
 0x100   : > { %794 = vrot.lane.b32.xlu2 %v2537_v43, %s2366_s16 }
 0x101   : > { %v857_v34 = vpop.permute.xlu1 %856 }
 0x102   : > { %761 = vrot.lane.b32.xlu0 %v2568_v55, %s2369_s19  ;;  %v1089_v49 = vsel %vm1075_vm11, %v1060_v35, %v857_v34  ;;  %v2907_v0 = vpop.permute.xlu2 %687 }
 0x103   : > { %2194 = vmatmul.msk.bf16.vlgmr.msra.gmra.mxu1 %vm1118_vm12, %v1089_v49 }
 0x104   : > { %v667_v17 = vpop.permute.xlu0 %666 }
 0x105   : > { %v923_v55 = vsel %vm901_vm5, %v894_v48, %v667_v17 }
 0x106   : > { %v952_v58 = vsel %vm930_vm6, %v923_v55, %v700_v1 }
 0x107   : > { %614 = vrot.lane.b32.xlu1 %v2755_v12, %s2370_s20 }
 0x108   : > { %830 = vrot.lane.b32.xlu2 %v2594_v5, %s2372_s22 }
 0x109   : > { %v766_v51 = vpop.permute.xlu1 %765 }
 0x10a   : > { %854 = vrot.lane.b32.xlu0 %v2682_v59, %s2368_s18  ;;  %v2919_v52 = vpop.permute.xlu2 %693  ;;  %v2931_v59 = vld [vmem:[%s2452_s14 + $0x78] sm:$0xff]  ;;  %s2376_s14 = smov 10  }
 0x10b   : > { %v842_v61 = vrot.slane %v2931_v59, 1  ;;  %v811_v26 = vshrl.u32 %v2931_v59, 16 }
 0x10c   : > { %v736_v53 = vpop.permute.xlu0 %735 }
 0x10d   : > { %v981_v45 = vsel %vm959_vm7, %v952_v58, %v736_v53 }
 0x10e   : > { %v1010_v43 = vsel %vm988_vm8, %v981_v45, %v766_v51 }
 0x10f   : > { %860 = vrot.lane.b32.xlu1 %v2586_v63, %s2368_s18  ;;  %v1039_v12 = vsel %vm1017_vm9, %v1010_v43, %v799_v25 }
 0x110   : > { %703 = vrot.lane.b32.xlu2 %v2721_v24, %s2365_s15 }
 0x111   : > { %v865_v5 = vpop.permute.xlu1 %864 }
 0x112   : > { %670 = vrot.lane.b32.xlu0 %v2748_v44, %s2367_s17  ;;  %v2935_v6 = vpop.permute.xlu2 %786  ;;  %v807_v44 = vshll.u32 %v2931_v59, 16 }
 0x114   : > { %v835_v41 = vpop.permute.xlu0 %834  ;;  %v1163_v16 = vpop.f32.mrf.mxu0  ;;  %v809_v2 = vrot.slane %v807_v44, 1 }
 0x115   : > { %v1068_v60 = vsel %vm1046_vm10, %v1039_v12, %v835_v41 }
 0x116   : > { %v1097_v63 = vsel %vm1075_vm11, %v1068_v60, %v865_v5  ;;  %v810_v1 = vsel %vm478_vm1, %v714_v18, %v809_v2  ;;  %v813_v29 = vor.u32 %v811_v26, %v809_v2 }
 0x117   : > { %2198 = vmatmul.msk.bf16.gmra.mxu2 %vm1118_vm12, %v1097_v63  ;;  %769 = vrot.lane.b32.xlu1 %v2848_v46, %s2369_s19  ;;  %v843_v46 = vsel %vm618_vm0, %v2834_v13, %v842_v61 }
 0x118   : > { %802 = vrot.lane.b32.xlu2 %v2823_v8, %s2366_s16 }
 0x119   : > { %v605_v37 = vpop.permute.xlu1 %604 }
 0x11a   : > { %739 = vrot.lane.b32.xlu0 %v2855_v14, %s2371_s21  ;;  %v793_v50 = vpop.permute.xlu2 %792  ;;  %v888_v23 = vsel %vm872_vm4, %v2602_v9, %v605_v37 }
 0x11c   : > { %v655_v19 = vpop.permute.xlu0 %654  ;;  %v1165_v7 = vpop.f32.mrf.mxu0 }
 0x11d   : > { %v1166_v27 = vadd.f32 %v2963_v10, %v1165_v7  ;;  %v911_v31 = vsel %vm901_vm5, %v882_v3, %v655_v19 }
 0x11e   : > { %v940_v35 = vsel %vm930_vm6, %v911_v31, %v2907_v0 }
 0x11f   : > { %868 = vrot.lane.b32.xlu1 %v843_v46, %s2368_s18  ;;  %v1234_v39 = vmax.f32 %v1166_v27, 0.0 }
 0x120   : > { %616 = vrot.lane.b32.xlu2 %v2841_v47, %s2370_s20  ;;  %s2382_s20 = smov 64  }
 0x121   : > { %v724_v57 = vpop.permute.xlu1 %723  ;;  %v1289_v33 = vrot.slane %v1234_v39, 1 }
 0x122   : > { %838 = vrot.lane.b32.xlu0 %v810_v1, %s2372_s22  ;;  %v829_v25 = vpop.permute.xlu2 %828 }
 0x124   : > { %v661_v14 = vpop.permute.xlu0 %660 }
 0x125   : > { %v917_v34 = vsel %vm901_vm5, %v888_v23, %v661_v14 }
 0x126   : > { %v946_v55 = vsel %vm930_vm6, %v917_v34, %v2919_v52 }
 0x127   : > { %705 = vrot.lane.b32.xlu1 %v2823_v8, %s2365_s15  ;;  %v1164_v8 = vadd.f32 %v2963_v10, %v1163_v16  ;;  %s2377_s15 = smov 60  }
 0x128   : > { %741 = vrot.lane.b32.xlu2 %v714_v18, %s2371_s21  ;;  %s2383_s21 = smov 32  }
 0x129   : > { %v730_v42 = vpop.permute.xlu1 %729  ;;  %v1233_v4 = vmax.f32 %v1164_v8, 0.0 }
 0x12a   : > { %672 = vrot.lane.b32.xlu0 %v2733_v32, %s2367_s17  ;;  %v702_v56 = vpop.permute.xlu2 %701  ;;  %v975_v58 = vsel %vm959_vm7, %v946_v55, %v730_v42  ;;  %s2379_s17 = smov 70  }
 0x12b   : > { %v1168_v47 = vpop.f32.mrf.mxu0  ;;  %v1288_v40 = vrot.slane %v1233_v4, 1 }
 0x12c   : > { %v754_v20 = vpop.permute.xlu0 %753  ;;  %v1169_v15 = vadd.f32 %v2963_v10, %v1168_v47 }
 0x12d   : > { %v1290_v9 = vsel %vm618_vm0, %v1288_v40, %v1289_v33 }
 0x12e   : > { %v1235_v38 = vmax.f32 %v1169_v15, 0.0  ;;  %v1365_v0 = vmax.f32 %v1233_v4, %v1290_v9 }
 0x12f   : > { %804 = vrot.lane.b32.xlu1 %v2931_v59, %s2366_s16  ;;  %s2378_s16 = smov 50  }
 0x130   : > { %840 = vrot.lane.b32.xlu2 %v813_v29, %s2372_s22  ;;  %v1291_v17 = vrot.slane %v1235_v38, 1 }
 0x131   : > { %v823_v32 = vpop.permute.xlu1 %822 }
 0x132   : > { %771 = vrot.lane.b32.xlu0 %v2834_v13, %s2369_s19  ;;  %v969_v13 = vsel %vm959_vm7, %v940_v35, %v724_v57  ;;  %v801_v11 = vpop.permute.xlu2 %800  ;;  %v1292_v18 = vsel %vm618_vm0, %v1289_v33, %v1291_v17  ;;  %s2381_s19 = smov 80  }
 0x133   : > { %v1170_v22 = vpop.f32.mrf.mxu0  ;;  %v998_v48 = vsel %vm988_vm8, %v969_v13, %v754_v20 }
 0x134   : > { %v1171_v28 = vadd.f32 %v2963_v10, %v1170_v22  ;;  %v760_v30 = vpop.permute.xlu0 %759  ;;  %v1027_v43 = vsel %vm1017_vm9, %v998_v48, %v2935_v6 }
 0x135   : > { %v1004_v59 = vsel %vm988_vm8, %v975_v58, %v760_v30  ;;  %v1056_v12 = vsel %vm1046_vm10, %v1027_v43, %v823_v32 }
 0x136   : > { %v1236_v49 = vmax.f32 %v1171_v28, 0.0  ;;  %v1033_v44 = vsel %vm1017_vm9, %v1004_v59, %v793_v50  ;;  %v1366_v50 = vmax.f32 %v1234_v39, %v1292_v18 }
 0x137   : > { %v1062_v16 = vsel %vm1046_vm10, %v1033_v44, %v829_v25 }
 0x138   : > { %v1293_v51 = vrot.slane %v1236_v49, 1 }
 0x139   : > { %v613_v53 = vpop.permute.xlu1 %612 }
 0x13a   : > { %v1294_v45 = vsel %vm618_vm0, %v1291_v17, %v1293_v51  ;;  %870 = vrot.lane.b32.xlu0 %v842_v61, %s2368_s18  ;;  %v896_v42 = vsel %vm872_vm4, %v2563_v54, %v613_v53  ;;  %v601_v26 = vpop.permute.xlu2 %600  ;;  %s2380_s18 = smov 30  }
 0x13b   : > { %v1367_v5 = vmax.f32 %v1235_v38, %v1294_v45  ;;  %v884_v48 = vsel %vm872_vm4, %v2518_v36, %v601_v26 }
 0x13c   : > { %v853_v41 = vpop.permute.xlu0 %852 }
 0x13d   : > { %v1403_v60 = vmax.f32 %v1365_v0, %v1367_v5  ;;  %v1173_v52 = vpop.f32.mrf.mxu0  ;;  %v1085_v63 = vsel %vm1075_vm11, %v1056_v12, %v853_v41 }
 0x13e   : > { %v1174_v61 = vadd.f32 %v2963_v10, %v1173_v52  ;;  %2192 = vmatmul.msk.bf16.gmra.mxu0 %vm1118_vm12, %v1085_v63 }
 0x13f   : > { %1430 = vst.msk [vmem:[#allocation2] sm:$0xff] %vm1429_vm13, %v1403_v60 }
 0x140   : > { %v1237_v6 = vmax.f32 %v1174_v61, 0.0 }
 0x141   : > { %v859_v37 = vpop.permute.xlu1 %858 }
 0x142   : > { %v1295_v2 = vrot.slane %v1237_v6, 1  ;;  %v1091_v19 = vsel %vm1075_vm11, %v1062_v16, %v859_v37  ;;  %v690_v31 = vpop.permute.xlu2 %689 }
 0x143   : > { %2195 = vmatmul.msk.bf16.gmra.mxu1 %vm1118_vm12, %v1091_v19 }
 0x144   : > { %v1296_v46 = vsel %vm618_vm0, %v1293_v51, %v1295_v2  ;;  %v669_v1 = vpop.permute.xlu0 %668 }
 0x145   : > { %v1368_v57 = vmax.f32 %v1236_v49, %v1296_v46  ;;  %v1175_v7 = vpop.f32.mrf.mxu0  ;;  %v925_v20 = vsel %vm901_vm5, %v896_v42, %v669_v1 }
 0x146   : > { %v3008_v14 = vadd.f32 %v2963_v10, %v1175_v7  ;;  %v954_v15 = vsel %vm930_vm6, %v925_v20, %v702_v56 }
 0x147   : > { %v1404_v25 = vmax.f32 %v1366_v50, %v1368_v57 }
 0x148   : > { %v1238_v47 = vmax.f32 %v3008_v14, 0.0 }
 0x149   : > { %1431 = vst.msk [vmem:[#allocation2 + $0x8] sm:$0xff] %vm1429_vm13, %v1404_v25  ;;  %v768_v27 = vpop.permute.xlu1 %767 }
 0x14a   : > { %v1297_v29 = vrot.slane %v1238_v47, 1  ;;  %v696_v30 = vpop.permute.xlu2 %695 }
 0x14c   : > { %v1298_v8 = vsel %vm618_vm0, %v1295_v2, %v1297_v29  ;;  %v738_v3 = vpop.permute.xlu0 %737 }
 0x14d   : > { %v3016_v39 = vmax.f32 %v1237_v6, %v1298_v8  ;;  %v983_v54 = vsel %vm959_vm7, %v954_v15, %v738_v3 }
 0x14e   : > { %v1012_v4 = vsel %vm988_vm8, %v983_v54, %v768_v27 }
 0x14f   : > { %v1041_v22 = vsel %vm1017_vm9, %v1012_v4, %v801_v11 }
 0x150   : > { %v1457_v32 = vld [vmem:[#allocation2] ss:$2 sm:$0x7f] }
 0x151   : > { %1459 = vst.msk [vmem:[#allocation3] sm:$0x7f] %vm1458_vm14, %v1457_v32  ;;  %v867_v23 = vpop.permute.xlu1 %866 }
 0x152   : > { %v789_v49 = vpop.permute.xlu2 %788 }
 0x154   : > { %v837_v33 = vpop.permute.xlu0 %836 }
 0x155   : > { %v1070_v38 = vsel %vm1046_vm10, %v1041_v22, %v837_v33 }
 0x156   : > { %v1099_v28 = vsel %vm1075_vm11, %v1070_v38, %v867_v23 }
 0x157   : > { %2199 = vmatmul.msk.bf16.gmra.mxu2 %vm1118_vm12, %v1099_v28 }
 0x159   : > { %v607_v56 = vpop.permute.xlu1 %606 }
 0x15a   : > { %v795_v17 = vpop.permute.xlu2 %794  ;;  %v890_v55 = vsel %vm872_vm4, %v2634_v21, %v607_v56  ;;  %v1208_v26 = vpop.f32.mrf.mxu2 }
 0x15c   : > { %v657_v40 = vpop.permute.xlu0 %656 }
 0x15d   : > { %v913_v53 = vsel %vm901_vm5, %v884_v48, %v657_v40 }
 0x15e   : > { %v942_v45 = vsel %vm930_vm6, %v913_v53, %v690_v31 }
 0x161   : > { %v726_v35 = vpop.permute.xlu1 %725 }
 0x162   : > { %v971_v43 = vsel %vm959_vm7, %v942_v45, %v726_v35  ;;  %v831_v12 = vpop.permute.xlu2 %830  ;;  %v1210_v23 = vpop.f32.mrf.mxu2 }
 0x164   : > { %v663_v34 = vpop.permute.xlu0 %662 }
 0x165   : > { %v919_v0 = vsel %vm901_vm5, %v890_v55, %v663_v34 }
 0x166   : > { %v948_v59 = vsel %vm930_vm6, %v919_v0, %v696_v30  ;;  %v3073_v30 = vadd.f32 %v2963_v10, %v1210_v23 }
 0x169   : > { %v732_v13 = vpop.permute.xlu1 %731 }
 0x16a   : > { %v977_v36 = vsel %vm959_vm7, %v948_v59, %v732_v13  ;;  %v704_v19 = vpop.permute.xlu2 %703  ;;  %v1252_v13 = vmax.f32 %v3073_v30, 0.0 }
 0x16c   : > { %v756_v9 = vpop.permute.xlu0 %755 }
 0x16d   : > { %v1000_v5 = vsel %vm988_vm8, %v971_v43, %v756_v9 }
 0x16e   : > { %v1029_v60 = vsel %vm1017_vm9, %v1000_v5, %v789_v49  ;;  %v1209_v49 = vadd.f32 %v2963_v10, %v1208_v26 }
 0x171   : > { %v825_v51 = vpop.permute.xlu1 %824 }
 0x172   : > { %v1058_v63 = vsel %vm1046_vm10, %v1029_v60, %v825_v51  ;;  %v803_v3 = vpop.permute.xlu2 %802  ;;  %v1251_v51 = vmax.f32 %v1209_v49, 0.0 }
 0x174   : > { %v762_v58 = vpop.permute.xlu0 %761  ;;  %v3089_v43 = vrot.slane %v1251_v51, 1 }
 0x175   : > { %v1006_v21 = vsel %vm988_vm8, %v977_v36, %v762_v58  ;;  %v3084_v58 = vrot.slane %v1252_v13, 1 }
 0x176   : > { %v1035_v6 = vsel %vm1017_vm9, %v1006_v21, %v795_v17 }
 0x177   : > { %v1064_v18 = vsel %vm1046_vm10, %v1035_v6, %v831_v12  ;;  %v1326_v36 = vsel %vm618_vm0, %v3089_v43, %v3084_v58 }
 0x179   : > { %v615_v41 = vpop.permute.xlu1 %614 }
 0x17a   : > { %v898_v25 = vsel %vm872_vm4, %v2583_v62, %v615_v41  ;;  %v617_v28 = vpop.permute.xlu2 %616 }
 0x17b   : > { %v1178_v52 = vpop.f32.mrf.mxu0  ;;  %v900_v40 = vsel %vm872_vm4, %v2721_v24, %v617_v28  ;;  %vm1646_vm4 = vcmask 162816  }
 0x17c   : > { %v1179_v11 = vadd.f32 %v2963_v10, %v1178_v52  ;;  %v855_v44 = vpop.permute.xlu0 %854 }
 0x17d   : > { %v1087_v61 = vsel %vm1075_vm11, %v1058_v63, %v855_v44  ;;  %v3099_v44 = vmax.f32 %v1251_v51, %v1326_v36 }
 0x17e   : > { %v1239_v16 = vmax.f32 %v1179_v11, 0.0  ;;  %2193 = vmatmul.msk.bf16.gmra.mxu0 %vm1118_vm12, %v1087_v61 }
 0x180   : > { %v1299_v37 = vrot.slane %v1239_v16, 1 }
 0x181   : > { %v861_v2 = vpop.permute.xlu1 %860 }
 0x182   : > { %v1300_v46 = vsel %vm618_vm0, %v1297_v29, %v1299_v37  ;;  %v1093_v1 = vsel %vm1075_vm11, %v1064_v18, %v861_v2  ;;  %v742_v48 = vpop.permute.xlu2 %741  ;;  %v1193_v18 = vpop.f32.mrf.mxu1 }
 0x183   : > { %v3047_v50 = vmax.f32 %v1238_v47, %v1300_v46  ;;  %v1180_v57 = vpop.f32.mrf.mxu0  ;;  %2196 = vmatmul.msk.bf16.gmra.mxu1 %vm1118_vm12, %v1093_v1 }
 0x184   : > { %v3051_v7 = vadd.f32 %v2963_v10, %v1180_v57  ;;  %v671_v14 = vpop.permute.xlu0 %670 }
 0x185   : > { %v927_v29 = vsel %vm901_vm5, %v898_v25, %v671_v14 }
 0x186   : > { %v1240_v42 = vmax.f32 %v3051_v7, 0.0  ;;  %v956_v32 = vsel %vm930_vm6, %v927_v29, %v704_v19 }
 0x188   : > { %v3058_v27 = vrot.slane %v1240_v42, 1 }
 0x189   : > { %v770_v20 = vpop.permute.xlu1 %769 }
 0x18a   : > { %v1302_v47 = vsel %vm618_vm0, %v1299_v37, %v3058_v27  ;;  %v841_v11 = vpop.permute.xlu2 %840  ;;  %v1195_v2 = vpop.f32.mrf.mxu1 }
 0x18b   : > { %v1371_v8 = vmax.f32 %v1239_v16, %v1302_v47  ;;  %v3106_v25 = vadd.f32 %v2963_v10, %v1195_v2 }
 0x18c   : > { %v740_v15 = vpop.permute.xlu0 %739 }
 0x18d   : > { %v1407_v54 = vmax.f32 %v3016_v39, %v1371_v8  ;;  %v985_v62 = vsel %vm959_vm7, %v956_v32, %v740_v15 }
 0x18e   : > { %v1014_v4 = vsel %vm988_vm8, %v985_v62, %v770_v20  ;;  %v1194_v20 = vadd.f32 %v2963_v10, %v1193_v18 }
 0x18f   : > { %1434 = vst.msk [vmem:[#allocation2 + $0x20] sm:$0xff] %vm1429_vm13, %v1407_v54  ;;  %v1043_v22 = vsel %vm1017_vm9, %v1014_v4, %v803_v3  ;;  %v1246_v3 = vmax.f32 %v3106_v25, 0.0 }
 0x190   : > { %v1245_v62 = vmax.f32 %v1194_v20, 0.0 }
 0x191   : > { %v869_v31 = vpop.permute.xlu1 %868  ;;  %v1313_v23 = vrot.slane %v1246_v3, 1 }
 0x194   : > { %v839_v33 = vpop.permute.xlu0 %838 }
 0x195   : > { %v1072_v38 = vsel %vm1046_vm10, %v1043_v22, %v839_v33  ;;  %v1311_v22 = vrot.slane %v1245_v62, 1 }
 0x196   : > { %v1101_v56 = vsel %vm1075_vm11, %v1072_v38, %v869_v31 }
 0x197   : > { %2200 = vmatmul.msk.bf16.gmra.mxu2 %vm1118_vm12, %v1101_v56  ;;  %v1314_v28 = vsel %vm618_vm0, %v1311_v22, %v1313_v23 }
 0x199   : > { %v706_v34 = vpop.permute.xlu1 %705 }
 0x19a   : > { %v1213_v39 = vpop.f32.mrf.mxu2 }
 0x19b   : > { %v1214_v9 = vadd.f32 %v2963_v10, %v1213_v39 }
 0x19c   : > { %v673_v35 = vpop.permute.xlu0 %672 }
 0x19d   : > { %v929_v17 = vsel %vm901_vm5, %v900_v40, %v673_v35  ;;  %v1253_v24 = vmax.f32 %v1214_v9, 0.0  ;;  %v1377_v35 = vmax.f32 %v1245_v62, %v1314_v28  ;;  %vm1653_vm5 = vcmask 244736  }
 0x19e   : > { %v958_v55 = vsel %vm930_vm6, %v929_v17, %v706_v34  ;;  %vm1660_vm6 = vcmask 326656  }
 0x19f   : > { %v987_v5 = vsel %vm959_vm7, %v958_v55, %v742_v48  ;;  %v1327_v60 = vrot.slane %v1253_v24, 1  ;;  %vm1667_vm7 = vcmask 408576  }
 0x1a1   : > { %v805_v41 = vpop.permute.xlu1 %804  ;;  %v1328_v51 = vsel %vm618_vm0, %v3084_v58, %v1327_v60 }
 0x1a2   : > { %v1215_v53 = vpop.f32.mrf.mxu2 }
 0x1a3   : > { %v3087_v45 = vadd.f32 %v2963_v10, %v1215_v53 }
 0x1a4   : > { %v772_v0 = vpop.permute.xlu0 %771 }
 0x1a5   : > { %v1254_v59 = vmax.f32 %v3087_v45, 0.0  ;;  %v1016_v12 = vsel %vm988_vm8, %v987_v5, %v772_v0  ;;  %v1384_v0 = vmax.f32 %v1252_v13, %v1328_v51  ;;  %vm1674_vm8 = vcmask 490496  }
 0x1a6   : > { %v1045_v63 = vsel %vm1017_vm9, %v1016_v12, %v805_v41  ;;  %vm1681_vm9 = vcmask 572416  }
 0x1a7   : > { %v1329_v21 = vrot.slane %v1254_v59, 1  ;;  %v1074_v6 = vsel %vm1046_vm10, %v1045_v63, %v841_v11  ;;  %vm1688_vm10 = vcmask 654336  }
 0x1a9   : > { %v1330_v52 = vsel %vm618_vm0, %v1327_v60, %v1329_v21 }
 0x1aa   : > { %v1385_v61 = vmax.f32 %v1253_v24, %v1330_v52 }
 0x1ac   : > { %v871_v16 = vpop.permute.xlu0 %870 }
 0x1ad   : > { %v1103_v37 = vsel %vm1075_vm11, %v1074_v6, %v871_v16  ;;  %vm1733_vm11 = vcmask 736256  }
 0x1ae   : > { %2201 = vmatmul.msk.bf16.vlgmr.msra.gmra.mxu3 %vm1118_vm12, %v1103_v37  ;;  %vm1868_vm12 = vcmask 130048  }
 0x1bb   : > { %v1183_v19 = vpop.f32.mrf.mxu0 }
 0x1bc   : > { %v1184_v46 = vadd.f32 %v2963_v10, %v1183_v19 }
 0x1be   : > { %v1241_v1 = vmax.f32 %v1184_v46, 0.0 }
 0x1c0   : > { %v1303_v57 = vrot.slane %v1241_v1, 1  ;;  %v1198_v14 = vpop.f32.mrf.mxu1 }
 0x1c1   : > { %v1199_v54 = vadd.f32 %v2963_v10, %v1198_v14 }
 0x1c2   : > { %v1304_v26 = vsel %vm618_vm0, %v3058_v27, %v1303_v57 }
 0x1c3   : > { %v1372_v47 = vmax.f32 %v1240_v42, %v1304_v26  ;;  %v1185_v29 = vpop.f32.mrf.mxu0  ;;  %v1247_v31 = vmax.f32 %v1199_v54, 0.0 }
 0x1c4   : > { %v1186_v8 = vadd.f32 %v2963_v10, %v1185_v29 }
 0x1c5   : > { %v1408_v15 = vmax.f32 %v3047_v50, %v1372_v47  ;;  %v1315_v50 = vrot.slane %v1247_v31, 1 }
 0x1c6   : > { %v1242_v32 = vmax.f32 %v1186_v8, 0.0 }
 0x1c7   : > { %1435 = vst.msk [vmem:[#allocation2 + $0x28] sm:$0xff] %vm1429_vm13, %v1408_v15  ;;  %v1316_v2 = vsel %vm618_vm0, %v1313_v23, %v1315_v50 }
 0x1c8   : > { %v1305_v4 = vrot.slane %v1242_v32, 1  ;;  %v1200_v27 = vpop.f32.mrf.mxu1 }
 0x1c9   : > { %v1201_v7 = vadd.f32 %v2963_v10, %v1200_v27 }
 0x1ca   : > { %v1306_v42 = vsel %vm618_vm0, %v1303_v57, %v1305_v4  ;;  %v1378_v57 = vmax.f32 %v1246_v3, %v1316_v2 }
 0x1cb   : > { %v1373_v33 = vmax.f32 %v1241_v1, %v1306_v42  ;;  %v1248_v38 = vmax.f32 %v1201_v7, 0.0 }
 0x1cd   : > { %v1317_v56 = vrot.slane %v1248_v38, 1 }
 0x1ce   : > { %v1461_v39 = vld [vmem:[#allocation2 + $0x20] ss:$2 sm:$0x7f] }
 0x1cf   : > { %v1318_v40 = vsel %vm618_vm0, %v1315_v50, %v1317_v56  ;;  %1462 = vst.msk [vmem:[#allocation3 + $0x7] sm:$0x7f] %vm1458_vm14, %v1461_v39 }
 0x1d0   : > { %v1379_v34 = vmax.f32 %v1247_v31, %v1318_v40 }
 0x1d2   : > { %v1415_v49 = vmax.f32 %v1377_v35, %v1379_v34 }
 0x1d4   : > { %1442 = vst.msk [vmem:[#allocation2 + $0x60] sm:$0xff] %vm1429_vm13, %v1415_v49 }
 0x1d6   : > { %v1478_v50 = vld [vmem:[#allocation3] sm:$0xff] }
 0x1da   : > { %v1218_v9 = vpop.f32.mrf.mxu2 }
 0x1db   : > { %v1219_v17 = vadd.f32 %v2963_v10, %v1218_v9 }
 0x1dd   : > { %v1255_v48 = vmax.f32 %v1219_v17, 0.0 }
 0x1df   : > { %v1331_v55 = vrot.slane %v1255_v48, 1 }
 0x1e1   : > { %v1332_v53 = vsel %vm618_vm0, %v1329_v21, %v1331_v55 }
 0x1e2   : > { %v3128_v24 = vmax.f32 %v1254_v59, %v1332_v53  ;;  %v1220_v45 = vpop.f32.mrf.mxu2 }
 0x1e3   : > { %v3133_v5 = vadd.f32 %v2963_v10, %v1220_v45 }
 0x1e5   : > { %v1256_v12 = vmax.f32 %v3133_v5, 0.0 }
 0x1e7   : > { %v1333_v41 = vrot.slane %v1256_v12, 1 }
 0x1e9   : > { %v1334_v36 = vsel %vm618_vm0, %v1331_v55, %v1333_v41 }
 0x1ea   : > { %v1387_v58 = vmax.f32 %v1255_v48, %v1334_v36 }
 0x1ec   : > { %v1423_v60 = vmax.f32 %v1385_v61, %v1387_v58 }
 0x1ee   : > { %1450 = vst.msk [vmem:[#allocation2 + $0xa0] sm:$0xff] %vm1429_vm13, %v1423_v60 }
 0x1fb   : > { %v1188_v59 = vpop.f32.mrf.mxu0 }
 0x1fc   : > { %v1189_v21 = vadd.f32 %v2963_v10, %v1188_v59 }
 0x1fe   : > { %v1243_v52 = vmax.f32 %v1189_v21, 0.0 }
 0x200   : > { %v1307_v30 = vrot.slane %v1243_v52, 1  ;;  %v1203_v13 = vpop.f32.mrf.mxu1 }
 0x201   : > { %v1204_v63 = vadd.f32 %v2963_v10, %v1203_v13 }
 0x202   : > { %v1308_v11 = vsel %vm618_vm0, %v1305_v4, %v1307_v30 }
 0x203   : > { %v1249_v6 = vmax.f32 %v1204_v63, 0.0  ;;  %v1190_v16 = vpop.f32.mrf.mxu0  ;;  %v1374_v37 = vmax.f32 %v1242_v32, %v1308_v11 }
 0x204   : > { %v1191_v18 = vadd.f32 %v2963_v10, %v1190_v16 }
 0x205   : > { %v1319_v61 = vrot.slane %v1249_v6, 1 }
 0x206   : > { %v1244_v19 = vmax.f32 %v1191_v18, 0.0 }
 0x207   : > { %v1320_v46 = vsel %vm618_vm0, %v1317_v56, %v1319_v61 }
 0x208   : > { %v1309_v1 = vrot.slane %v1244_v19, 1  ;;  %v1205_v14 = vpop.f32.mrf.mxu1  ;;  %v1380_v25 = vmax.f32 %v1248_v38, %v1320_v46 }
 0x209   : > { %v1206_v26 = vadd.f32 %v2963_v10, %v1205_v14 }
 0x20a   : > { %v1310_v20 = vsel %vm618_vm0, %v1307_v30, %v1309_v1  ;;  %v1312_v47 = vsel %vm618_vm0, %v1309_v1, %v1311_v22  ;;  %v1416_v29 = vmax.f32 %v1378_v57, %v1380_v25 }
 0x20b   : > { %v1375_v8 = vmax.f32 %v1243_v52, %v1310_v20  ;;  %v1376_v15 = vmax.f32 %v1244_v19, %v1312_v47  ;;  %v1250_v54 = vmax.f32 %v1206_v26, 0.0 }
 0x20c   : > { %1443 = vst.msk [vmem:[#allocation2 + $0x68] sm:$0xff] %vm1429_vm13, %v1416_v29 }
 0x20d   : > { %v1411_v32 = vmax.f32 %v1373_v33, %v1375_v8  ;;  %v1412_v62 = vmax.f32 %v1374_v37, %v1376_v15  ;;  %v1321_v4 = vrot.slane %v1250_v54, 1 }
 0x20f   : > { %1438 = vst.msk [vmem:[#allocation2 + $0x40] sm:$0xff] %vm1429_vm13, %v1411_v32  ;;  %v1322_v3 = vsel %vm618_vm0, %v1319_v61, %v1321_v4  ;;  %v1324_v27 = vsel %vm618_vm0, %v1321_v4, %v3089_v43 }
 0x210   : > { %1439 = vst.msk [vmem:[#allocation2 + $0x48] sm:$0xff] %vm1429_vm13, %v1412_v62  ;;  %v1381_v23 = vmax.f32 %v1249_v6, %v1322_v3  ;;  %v1382_v31 = vmax.f32 %v1250_v54, %v1324_v27 }
 0x212   : > { %v1419_v7 = vmax.f32 %v1381_v23, %v3099_v44  ;;  %v1420_v22 = vmax.f32 %v1382_v31, %v1384_v0  ;;  %v1485_v44 = vpack.c.bf16 %v1478_v50, %v1478_v50 }
 0x213   : > { %v1467_v42 = vld [vmem:[#allocation2 + $0x60] ss:$2 sm:$0x7f] }
 0x214   : > { %1468 = vst.msk [vmem:[#allocation3 + $0x15] sm:$0x7f] %vm1458_vm14, %v1467_v42  ;;  %v1497_v45 = vunpack.c.l.b16 %v1485_v44 }
 0x215   : > { %1446 = vst.msk [vmem:[#allocation2 + $0x80] sm:$0xff] %vm1429_vm13, %v1419_v7 }
 0x216   : > { %1447 = vst.msk [vmem:[#allocation2 + $0x88] sm:$0xff] %vm1429_vm13, %v1420_v22 }
 0x217   : > { %v1464_v33 = vld [vmem:[#allocation2 + $0x40] ss:$2 sm:$0x7f] }
 0x218   : > { %1465 = vst.msk [vmem:[#allocation3 + $0xe] sm:$0x7f] %vm1458_vm14, %v1464_v33 }
 0x21a   : > { %v1223_v38 = vpop.f32.mrf.mxu2 }
 0x21b   : > { %v1224_v28 = vadd.f32 %v2963_v10, %v1223_v38 }
 0x21d   : > { %v1257_v43 = vmax.f32 %v1224_v28, 0.0  ;;  %v1470_v35 = vld [vmem:[#allocation2 + $0x80] ss:$2 sm:$0x7f] }
 0x21e   : > { %1471 = vst.msk [vmem:[#allocation3 + $0x1c] sm:$0x7f] %vm1458_vm14, %v1470_v35 }
 0x21f   : > { %v1335_v56 = vrot.slane %v1257_v43, 1  ;;  %v1479_v39 = vld [vmem:[#allocation3 + $0x8] sm:$0xff]  ;;  %v1480_v40 = vld [vmem:[#allocation3 + $0x10] sm:$0xff] }
 0x220   : > { %v1486_v34 = vpack.c.bf16 %v1479_v39, %v1479_v39  ;;  %v1487_v49 = vpack.c.bf16 %v1480_v40, %v1480_v40 }
 0x221   : > { %v1336_v9 = vsel %vm618_vm0, %v1333_v41, %v1335_v56 }
 0x222   : > { %v1388_v17 = vmax.f32 %v1256_v12, %v1336_v9  ;;  %v1225_v48 = vpop.f32.mrf.mxu2  ;;  %v1498_v51 = vunpack.c.l.b16 %v1486_v34  ;;  %v1499_v55 = vunpack.c.l.b16 %v1487_v49 }
 0x223   : > { %v1226_v53 = vadd.f32 %v2963_v10, %v1225_v48 }
 0x224   : > { %v1424_v0 = vmax.f32 %v3128_v24, %v1388_v17  ;;  %v1564_v36 = vpack.c.b16 %v1499_v55, %v1498_v51  ;;  %v3167_v60 = vpack.c.b16 %v1498_v51, %v1497_v45 }
 0x225   : > { %v1258_v58 = vmax.f32 %v1226_v53, 0.0  ;;  %v1481_v5 = vld [vmem:[#allocation3 + $0x18] sm:$0xff] }
 0x226   : > { %1451 = vst.msk [vmem:[#allocation2 + $0xa8] sm:$0xff] %vm1429_vm13, %v1424_v0  ;;  %1567 = vrot.lane.b32.xlu1 %v1564_v36, %s2374_s12  ;;  %v1488_v59 = vpack.c.bf16 %v1481_v5, %v1481_v5  ;;  %v1508_v21 = vshll.u32 %v3167_v60, 16  ;;  %v1533_v11 = vrot.slane %v3167_v60, 1  ;;  %v1506_v16 = vshrl.u32 %v3167_v60, 16 }
 0x227   : > { %v1337_v41 = vrot.slane %v1258_v58, 1  ;;  %v1576_v25 = vshll.u32 %v1564_v36, 16  ;;  %v1574_v47 = vshrl.u32 %v1564_v36, 16  ;;  %v1602_v4 = vrot.slane %v1564_v36, 3 }
 0x228   : > { %v1500_v30 = vunpack.c.l.b16 %v1488_v59  ;;  %v1510_v63 = vrot.slane %v1508_v21, 1  ;;  %v1545_v40 = vrot.slane %v1506_v16, 3  ;;  %v1546_v44 = vrot.slane %v1508_v21, 4 }
 0x229   : > { %v1338_v12 = vsel %vm618_vm0, %v1335_v56, %v1337_v41  ;;  %v1578_v15 = vrot.slane %v1576_v25, 1  ;;  %v1613_v3 = vrot.slane %v1574_v47, 3  ;;  %v1614_v22 = vrot.slane %v1576_v25, 4 }
 0x22a   : > { %v3173_v52 = vmax.f32 %v1257_v43, %v1338_v12  ;;  %v3175_v13 = vpack.c.b16 %v1500_v30, %v1499_v55  ;;  %v1511_v2 = vor.u32 %v1510_v63, %v1506_v16  ;;  %v1390_v56 = vmax.f32 %v1258_v58, %v1337_v41 }
 0x22b   : > { %v1579_v42 = vor.u32 %v1578_v15, %v1574_v47  ;;  %v1615_v48 = vor.u32 %v1614_v22, %v1613_v3  ;;  %v1547_v36 = vor.u32 %v1546_v44, %v1545_v40  ;;  %v2285_v22 = vld [vmem:[%s3412_s3 + $0x10] sm:$0xff] }
 0x22c   : > { %v1534_v6 = vrot.slane %v3175_v13, 1  ;;  %v1513_v37 = vshll.u32 %v3175_v13, 16  ;;  %v1517_v54 = vshrl.u32 %v3175_v13, 16 }
 0x22d   : > { %v1473_v24 = vld [vmem:[#allocation2 + $0xa0] ss:$2 sm:$0x7f] }
 0x22e   : > { %1474 = vst.msk [vmem:[#allocation3 + $0x23] sm:$0x7f] %vm1458_vm14, %v1473_v24  ;;  %v1535_v18 = vsel %vm618_vm0, %v1533_v11, %v1534_v6  ;;  %v3185_v61 = vrot.slane %v1513_v37, 1  ;;  %v1548_v33 = vrot.slane %v1517_v54, 3  ;;  %v1549_v38 = vrot.slane %v1513_v37, 4 }
 0x22f   : > { %1538 = vrot.lane.b32.xlu2 %v1535_v18, %s2375_s13 }
 0x230   : > { %v1516_v1 = vsel %vm478_vm1, %v1511_v2, %v3185_v61  ;;  %v1550_v53 = vor.u32 %v1549_v38, %v1548_v33  ;;  %v1519_v16 = vor.u32 %v1517_v54, %v3185_v61  ;;  %v2284_v33 = vld [vmem:[%s3412_s3 + $0x8] sm:$0xff]  ;;  %v2283_v38 = vld [vmem:[%s3412_s3] sm:$0xff] }
 0x231   : > { %v1228_v19 = vpop.f32.mrf.mxu3  ;;  %1527 = vrot.lane.b32.xlu1 %v1516_v1, %s2376_s14 }
 0x232   : > { %v1229_v46 = vadd.f32 %v2963_v10, %v1228_v19  ;;  %v1551_v5 = vsel %vm1544_vm3, %v1547_v36, %v1550_v53 }
 0x234   : > { %v1259_v57 = vmax.f32 %v1229_v46, 0.0 }
 0x235   : > { %v1482_v14 = vld [vmem:[#allocation3 + $0x20] sm:$0xff] }
 0x236   : > { %v1393_v26 = vrot.slane %v1259_v57, 1  ;;  %v1489_v20 = vpack.c.bf16 %v1482_v14, %v1482_v14 }
 0x238   : > { %v3192_v29 = vunpack.c.l.b16 %v1489_v20 }
 0x239   : > { %v1230_v8 = vpop.f32.mrf.mxu3 }
 0x23a   : > { %v1231_v32 = vadd.f32 %v2963_v10, %v1230_v8  ;;  %v3197_v62 = vpack.c.b16 %v3192_v29, %v1500_v30  ;;  %v3212_v9 = vpack.c.b16 %v3192_v29, %v3192_v29 }
 0x23c   : > { %v1260_v27 = vmax.f32 %v1231_v32, 0.0  ;;  %v1603_v23 = vrot.slane %v3197_v62, 3  ;;  %v1581_v31 = vshll.u32 %v3197_v62, 16  ;;  %v1585_v7 = vshrl.u32 %v3197_v62, 16 }
 0x23d   : > { %v1521_v58 = vshll.u32 %v3212_v9, 16  ;;  %v1525_v41 = vshrl.u32 %v3212_v9, 16  ;;  %v1536_v12 = vrot.slane %v3212_v9, 1 }
 0x23e   : > { %v1395_v28 = vrot.slane %v1260_v27, 1  ;;  %v1604_v10 = vsel %vm1147_vm2, %v1602_v4, %v1603_v23  ;;  %v1583_v50 = vrot.slane %v1581_v31, 1  ;;  %v1616_v43 = vrot.slane %v1585_v7, 3 }
 0x23f   : > { %1607 = vrot.lane.b32.xlu0 %v1604_v10, %s2377_s15  ;;  %v1617_v39 = vrot.slane %v1581_v31, 4  ;;  %v1552_v59 = vrot.slane %v1525_v41, 3  ;;  %v1553_v21 = vrot.slane %v1521_v58, 4  ;;  %v1523_v11 = vrot.slane %v1521_v58, 1 }
 0x240   : > { %v1396_v35 = vsel %vm618_vm0, %v1393_v26, %v1395_v28  ;;  %v1402_v34 = vmax.f32 %v1260_v27, %v1395_v28  ;;  %v1584_v49 = vsel %vm478_vm1, %v1579_v42, %v1583_v50  ;;  %v1587_v14 = vor.u32 %v1585_v7, %v1583_v50  ;;  %v2288_v27 = vld [vmem:[%s3412_s3 + $0x28] sm:$0x10]  ;;  %v2287_v7 = vld [vmem:[%s3412_s3 + $0x20] sm:$0xff]  ;;  %v2286_v42 = vld [vmem:[%s3412_s3 + $0x18] sm:$0xff] }
 0x241   : > { %v1401_v17 = vmax.f32 %v1259_v57, %v1396_v35  ;;  %1595 = vrot.lane.b32.xlu2 %v1584_v49, %s2378_s16  ;;  %v1618_v51 = vor.u32 %v1617_v39, %v1616_v43  ;;  %v1554_v24 = vor.u32 %v1553_v21, %v1552_v59 }
 0x242   : > { %v1428_v55 = vmax.f32 %v1390_v56, %v1402_v34 }
 0x243   : > { %v1427_v45 = vmax.f32 %v3173_v52, %v1401_v17  ;;  %v1619_v0 = vsel %vm1544_vm3, %v1615_v48, %v1618_v51  ;;  %v1537_v52 = vsel %vm618_vm0, %v1534_v6, %v1536_v12  ;;  %v1555_v63 = vsel %vm1544_vm3, %v1550_v53, %v1554_v24 }
 0x244   : > { %1456 = vst.msk [vmem:[#allocation2 + $0xc8] sm:$0x1f] %vm1455_vm15, %v1428_v55  ;;  %1624 = vrot.lane.b32.xlu1 %v1619_v0, %s2379_s17  ;;  %v1524_v6 = vsel %vm478_vm1, %v1519_v16, %v1523_v11 }
 0x245   : > { %1454 = vst.msk [vmem:[#allocation2 + $0xc0] sm:$0xff] %vm1429_vm13, %v1427_v45 }
 0x247   : > { %1556 = vrot.lane.b32.xlu0 %v1551_v5, %s2380_s18 }
 0x249   : > { %1634 = vrot.lane.b32.xlu2 %v3175_v13, %s2381_s19 }
 0x24c   : > { %v1476_v30 = vld [vmem:[#allocation2 + $0xc0] ss:$2 sm:$0x7f]  ;;  %1540 = vrot.lane.b32.xlu1 %v1537_v52, %s2375_s13 }
 0x24d   : > { %1477 = vst.msk [vmem:[#allocation3 + $0x2a] sm:$0x7f] %vm1458_vm14, %v1476_v30  ;;  %vm1897_vm14 = vcmask 916480  }
 0x24f   : > { %1569 = vrot.lane.b32.xlu0 %v3197_v62, %s2374_s12 }
 0x251   : > { %1558 = vrot.lane.b32.xlu2 %v1555_v63, %s2380_s18 }
 0x254   : > { %v1483_v37 = vld [vmem:[#allocation3 + $0x28] sm:$0xff]  ;;  %v1484_v32 = vld [vmem:[#allocation3 + $0x30] sm:$0x1] }
 0x255   : > { %v1490_v18 = vpack.c.bf16 %v1483_v37, %v1483_v37  ;;  %v1491_v62 = vpack.c.bf16 %v1484_v32, %v1484_v32  ;;  %v2297_v32 = vld [vmem:[%s3414_s5 + $0x40] sm:$0xff] }
 0x256   : > { %1992 = vmatpush.bf16.msrb.mxu3 %v2297_v32 }
 0x257   : > { %1529 = vrot.lane.b32.xlu0 %v1524_v6, %s2376_s14  ;;  %v1563_v2 = vunpack.c.l.b16 %v1490_v18  ;;  %v1631_v4 = vunpack.c.l.b16 %v1491_v62 }
 0x259   : > { %v1566_v19 = vpack.c.b16 %v1563_v2, %v1563_v2  ;;  %v1632_v54 = vpack.c.b16 %v1563_v2, %v3192_v29  ;;  %v1633_v3 = vpack.c.b16 %v1631_v4, %v1631_v4  ;;  %v2224_v29 = vld [vmem:[%s3412_s3 + $0x28] sm:$0xf] }
 0x25b   : > { %v1605_v46 = vrot.slane %v1566_v19, 3  ;;  %v1589_v1 = vshll.u32 %v1566_v19, 16  ;;  %v1593_v57 = vshrl.u32 %v1566_v19, 16 }
 0x25d   : > { %v1606_v25 = vsel %vm1147_vm2, %v1603_v23, %v1605_v46  ;;  %v1591_v26 = vrot.slane %v1589_v1, 1  ;;  %v1620_v61 = vrot.slane %v1593_v57, 3  ;;  %v1621_v20 = vrot.slane %v1589_v1, 4 }
 0x25e   : > { %1609 = vrot.lane.b32.xlu2 %v1606_v25, %s2377_s15  ;;  %v2225_v23 = vor.u32 %v2288_v27, %v2224_v29 }
 0x25f   : > { %v1592_v47 = vsel %vm478_vm1, %v1587_v14, %v1591_v26  ;;  %v1622_v8 = vor.u32 %v1621_v20, %v1620_v61 }
 0x260   : > { %1597 = vrot.lane.b32.xlu1 %v1592_v47, %s2378_s16  ;;  %v1741_v31 = vsel %vm1147_vm2, %v2225_v23, 0 }
 0x261   : > { %v1623_v15 = vsel %vm1544_vm3, %v1618_v51, %v1622_v8  ;;  %1745 = vmatpush.bf16.msrb.mxu1 %v1741_v31 }
 0x262   : > { %1626 = vrot.lane.b32.xlu0 %v1623_v15, %s2379_s17 }
 0x265   : > { %1746 = vmatpush.bf16.msrb.mxu1 %v2287_v7 }
 0x266   : > { %1531 = vrot.lane.b32.xlu2 %v1525_v41, %s2376_s14  ;;  %s2387_s14 = smov 112  }
 0x268   : > { %1636 = vrot.lane.b32.xlu1 %v1632_v54, %s2381_s19  ;;  %v2354_v54 = vld [vmem:[%s3413_s4] ss:$0 sm:$0xff] }
 0x269   : > { %1747 = vmatpush.bf16.msrb.mxu1 %v2286_v42 }
 0x26a   : > { %1542 = vrot.lane.b32.xlu0 %v1536_v12, %s2375_s13 }
 0x26d   : > { %1748 = vmatpush.bf16.msrb.mxu1 %v2285_v22 }
 0x26e   : > { %1571 = vrot.lane.b32.xlu2 %v1566_v19, %s2374_s12 }
 0x270   : > { %1560 = vrot.lane.b32.xlu1 %v1552_v59, %s2380_s18 }
 0x271   : > { %1749 = vmatpush.bf16.msrb.mxu1 %v2284_v33 }
 0x272   : > { %1599 = vrot.lane.b32.xlu0 %v1593_v57, %s2378_s16 }
 0x275   : > { %1750 = vmatpush.bf16.msrb.mxu1 %v2283_v38 }
 0x276   : > { %1628 = vrot.lane.b32.xlu2 %v1620_v61, %s2379_s17 }
 0x278   : > { %1611 = vrot.lane.b32.xlu1 %v1605_v46, %s2377_s15  ;;  %s332_s15 = scalar_lea.vmem %s3418_s9, %s2280_s29 }
 0x27a   : > { %1638 = vrot.lane.b32.xlu0 %v1633_v3, %s2381_s19 }
 0x289   : > { %v1539_v28 = vpop.permute.xlu2 %1538 }
 0x298   : > { %v1568_v10 = vpop.permute.xlu1 %1567 }
 0x29b   : > { %v1596_v50 = vpop.permute.xlu2 %1595 }
 0x2a3   : > { %v1528_v56 = vpop.permute.xlu1 %1527  ;;  %v1635_v34 = vpop.permute.xlu2 %1634 }
 0x2a4   : > { %v1641_v39 = vsel %vm1429_vm13, %v3167_v60, %v1528_v56 }
 0x2a5   : > { %v1648_v40 = vsel %vm1646_vm4, %v1641_v39, %v1539_v28 }
 0x2ab   : > { %v1559_v45 = vpop.permute.xlu2 %1558 }
 0x2b1   : > { %v1608_v43 = vpop.permute.xlu0 %1607 }
 0x2b6   : > { %v1625_v48 = vpop.permute.xlu1 %1624 }
 0x2b8   : > { %v1610_v41 = vpop.permute.xlu2 %1609 }
 0x2b9   : > { %v1557_v44 = vpop.permute.xlu0 %1556 }
 0x2ba   : > { %v1655_v35 = vsel %vm1653_vm5, %v1648_v40, %v1557_v44 }
 0x2bb   : > { %v1662_v49 = vsel %vm1660_vm6, %v1655_v35, %v1568_v10 }
 0x2bc   : > { %v1669_v17 = vsel %vm1667_vm7, %v1662_v49, %v1596_v50 }
 0x2bd   : > { %v1676_v60 = vsel %vm1674_vm8, %v1669_v17, %v1608_v43 }
 0x2be   : > { %v1683_v51 = vsel %vm1681_vm9, %v1676_v60, %v1625_v48  ;;  %v1541_v36 = vpop.permute.xlu1 %1540 }
 0x2bf   : > { %v1690_v55 = vsel %vm1688_vm10, %v1683_v51, %v1635_v34 }
 0x2c0   : > { %2226 = vmatmul.msk.bf16.vlgmr.msrb.gmra.mxu1 %vm1733_vm11, %v1690_v55  ;;  %v1532_v24 = vpop.permute.xlu2 %1531 }
 0x2c1   : > { %v1570_v53 = vpop.permute.xlu0 %1569  ;;  %v1645_v6 = vsel %vm1429_vm13, %v3212_v9, %v1532_v24  ;;  %v2296_v24 = vld [vmem:[%s3414_s5 + $0x38] sm:$0xff] }
 0x2c2   : > { %1967 = vmatpush.bf16.msrb.mxu2 %v2296_v24 }
 0x2c8   : > { %v1572_v18 = vpop.permute.xlu2 %1571 }
 0x2c9   : > { %v1530_v0 = vpop.permute.xlu0 %1529 }
 0x2ca   : > { %v1643_v58 = vsel %vm1429_vm13, %v3175_v13, %v1530_v0  ;;  %vm1892_vm13 = vcmask 785408  }
 0x2cb   : > { %v1650_v5 = vsel %vm1646_vm4, %v1643_v58, %v1541_v36 }
 0x2cc   : > { %v1657_v12 = vsel %vm1653_vm5, %v1650_v5, %v1559_v45 }
 0x2cd   : > { %v1664_v21 = vsel %vm1660_vm6, %v1657_v12, %v1570_v53 }
 0x2d0   : > { %v1629_v26 = vpop.permute.xlu2 %1628 }
 0x2d2   : > { %v1598_v59 = vpop.permute.xlu1 %1597 }
 0x2d3   : > { %v1671_v52 = vsel %vm1667_vm7, %v1664_v21, %v1598_v59 }
 0x2d4   : > { %v1627_v30 = vpop.permute.xlu0 %1626  ;;  %v1678_v63 = vsel %vm1674_vm8, %v1671_v52, %v1610_v41 }
 0x2d5   : > { %v1685_v11 = vsel %vm1681_vm9, %v1678_v63, %v1627_v30 }
 0x2da   : > { %v1637_v16 = vpop.permute.xlu1 %1636 }
 0x2db   : > { %v1692_v37 = vsel %vm1688_vm10, %v1685_v11, %v1637_v16 }
 0x2dc   : > { %2227 = vmatmul.msk.bf16.gmra.mxu1 %vm1733_vm11, %v1692_v37  ;;  %v1543_v13 = vpop.permute.xlu0 %1542 }
 0x2dd   : > { %v1652_v19 = vsel %vm1646_vm4, %v1645_v6, %v1543_v13 }
 0x2e2   : > { %v1561_v2 = vpop.permute.xlu1 %1560 }
 0x2e3   : > { %v1659_v46 = vsel %vm1653_vm5, %v1652_v19, %v1561_v2 }
 0x2e4   : > { %v1600_v1 = vpop.permute.xlu0 %1599  ;;  %v1666_v57 = vsel %vm1660_vm6, %v1659_v46, %v1572_v18  ;;  %v2295_v18 = vld [vmem:[%s3414_s5 + $0x30] sm:$0xff] }
 0x2e5   : > { %v1673_v14 = vsel %vm1667_vm7, %v1666_v57, %v1600_v1  ;;  %1968 = vmatpush.bf16.msrb.mxu2 %v2295_v18 }
 0x2ea   : > { %v1612_v25 = vpop.permute.xlu1 %1611 }
 0x2eb   : > { %v1680_v61 = vsel %vm1674_vm8, %v1673_v14, %v1612_v25 }
 0x2ec   : > { %v1639_v20 = vpop.permute.xlu0 %1638  ;;  %v1687_v47 = vsel %vm1681_vm9, %v1680_v61, %v1629_v26 }
 0x2ed   : > { %v1694_v8 = vsel %vm1688_vm10, %v1687_v47, %v1639_v20  ;;  %v2294_v47 = vld [vmem:[%s3414_s5 + $0x28] sm:$0xff] }
 0x2ee   : > { %2228 = vmatmul.msk.bf16.gmra.mxu1 %vm1733_vm11, %v1694_v8  ;;  %1969 = vmatpush.bf16.msrb.mxu2 %v2294_v47 }
 0x33d   : > { %v1752_v9 = vpop.f32.mrf.mxu1 }
 0x33e   : > { %v1753_v4 = vadd.f32 %v2354_v54, %v1752_v9 }
 0x340   : > { %v1766_v29 = vmax.f32 %v1753_v4, 0.0 }
 0x342   : > { %v1771_v23 = vpack.c.bf16 %v1766_v29, %v1766_v29  ;;  %v2293_v29 = vld [vmem:[%s3414_s5 + $0x20] sm:$0xff] }
 0x343   : > { %1970 = vmatpush.bf16.msrb.mxu2 %v2293_v29 }
 0x344   : > { %v1779_v7 = vunpack.c.l.b16 %v1771_v23 }
 0x345   : > { %v1754_v15 = vpop.f32.mrf.mxu1 }
 0x346   : > { %v1755_v62 = vadd.f32 %v2354_v54, %v1754_v15 }
 0x348   : > { %v1767_v3 = vmax.f32 %v1755_v62, 0.0 }
 0x34a   : > { %v1772_v27 = vpack.c.bf16 %v1767_v3, %v1767_v3 }
 0x34c   : > { %v1780_v31 = vunpack.c.l.b16 %v1772_v27 }
 0x34e   : > { %v3316_v33 = vpack.c.b16 %v1780_v31, %v1779_v7  ;;  %v2291_v7 = vld [vmem:[%s3414_s5 + $0x10] sm:$0xff] }
 0x350   : > { %v1785_v10 = vshrl.u32 %v3316_v33, 16  ;;  %v1787_v50 = vshll.u32 %v3316_v33, 16  ;;  %v1802_v35 = vrot.slane %v3316_v33, 1 }
 0x352   : > { %v1809_v34 = vrot.slane %v1785_v10, 3  ;;  %v1810_v49 = vrot.slane %v1787_v50, 4  ;;  %v1789_v55 = vrot.slane %v1787_v50, 1 }
 0x354   : > { %v1811_v12 = vor.u32 %v1810_v49, %v1809_v34  ;;  %v1790_v21 = vor.u32 %v1789_v55, %v1785_v10 }
 0x359   : > { %v1757_v42 = vpop.f32.mrf.mxu1 }
 0x35a   : > { %v1758_v22 = vadd.f32 %v2354_v54, %v1757_v42  ;;  %v2290_v42 = vld [vmem:[%s3414_s5 + $0x8] sm:$0xff] }
 0x35c   : > { %v1768_v38 = vmax.f32 %v1758_v22, 0.0  ;;  %v2289_v22 = vld [vmem:[%s3414_s5] sm:$0xff] }
 0x35e   : > { %v1773_v28 = vpack.c.bf16 %v1768_v38, %v1768_v38 }
 0x360   : > { %v1781_v43 = vunpack.c.l.b16 %v1773_v28 }
 0x361   : > { %v1759_v56 = vpop.f32.mrf.mxu1 }
 0x362   : > { %v3320_v39 = vpack.c.b16 %v1781_v43, %v1781_v43  ;;  %v1822_v40 = vpack.c.b16 %v1781_v43, %v1780_v31  ;;  %v1760_v44 = vadd.f32 %v2354_v54, %v1759_v56  ;;  %v2292_v31 = vld [vmem:[%s3414_s5 + $0x18] sm:$0xff] }
 0x363   : > { %1971 = vmatpush.bf16.msrb.mxu2 %v2292_v31 }
 0x364   : > { %v1769_v17 = vmax.f32 %v1760_v44, 0.0  ;;  %1824 = vrot.lane.b32.xlu1 %v1822_v40, %s2382_s20  ;;  %v1803_v48 = vrot.slane %v3320_v39, 1  ;;  %v1792_v60 = vshll.u32 %v3320_v39, 16  ;;  %v1796_v51 = vshrl.u32 %v3320_v39, 16 }
 0x365   : > { %v1831_v53 = vshll.u32 %v1822_v40, 16  ;;  %v1829_v52 = vshrl.u32 %v1822_v40, 16  ;;  %v1846_v9 = vrot.slane %v1822_v40, 3 }
 0x366   : > { %v1774_v45 = vpack.c.bf16 %v1769_v17, %v1769_v17  ;;  %v1804_v0 = vsel %vm618_vm0, %v1802_v35, %v1803_v48  ;;  %v1812_v36 = vrot.slane %v1796_v51, 3  ;;  %v1813_v58 = vrot.slane %v1792_v60, 4 }
 0x367   : > { %1805 = vrot.lane.b32.xlu2 %v1804_v0, %s2383_s21  ;;  %v1794_v41 = vrot.slane %v1792_v60, 1  ;;  %v1833_v30 = vrot.slane %v1831_v53, 1  ;;  %v1853_v1 = vrot.slane %v1829_v52, 3  ;;  %v1854_v57 = vrot.slane %v1831_v53, 4  ;;  %1972 = vmatpush.bf16.msrb.mxu2 %v2291_v7 }
 0x368   : > { %v1821_v5 = vunpack.c.l.b16 %v1774_v45  ;;  %v1814_v59 = vor.u32 %v1813_v58, %v1812_v36  ;;  %vm1873_vm0 = vcmask 261120  }
 0x369   : > { %v1795_v13 = vsel %vm478_vm1, %v1790_v21, %v1794_v41  ;;  %v1834_v46 = vor.u32 %v1833_v30, %v1829_v52  ;;  %v1855_v15 = vor.u32 %v1854_v57, %v1853_v1 }
 0x36a   : > { %v1823_v63 = vpack.c.b16 %v1821_v5, %v1821_v5  ;;  %v1866_v11 = vpack.c.b16 %v1821_v5, %v1781_v43  ;;  %v1815_v16 = vsel %vm1544_vm3, %v1811_v12, %v1814_v59 }
 0x36b   : > { %1816 = vrot.lane.b32.xlu0 %v1815_v16, %s2384_s24  ;;  %v1762_v37 = vpop.f32.mrf.mxu1  ;;  %1973 = vmatpush.bf16.msrb.mxu2 %v2290_v42  ;;  %v2298_v16 = vld [vmem:[%s3416_s7] sm:$0xff] }
 0x36c   : > { %v1763_v6 = vadd.f32 %v2354_v54, %v1762_v37  ;;  %2265 = vmatmul.msk.bf16.vlgmr.msrb.gmra.mxu3 %vm1868_vm12, %v1866_v11  ;;  %1798 = vrot.lane.b32.xlu1 %v1795_v13, %s2385_s27  ;;  %v1836_v2 = vshll.u32 %v1823_v63, 16  ;;  %v1840_v19 = vshrl.u32 %v1823_v63, 16  ;;  %v1847_v26 = vrot.slane %v1823_v63, 3  ;;  %v2355_v13 = vld [vmem:[%s3415_s6] ss:$0 sm:$0xff] }
 0x36e   : > { %v1770_v14 = vmax.f32 %v1763_v6, 0.0  ;;  %v1838_v25 = vrot.slane %v1836_v2, 1  ;;  %v1856_v61 = vrot.slane %v1840_v19, 3  ;;  %v1857_v20 = vrot.slane %v1836_v2, 4 }
 0x36f   : > { %v1848_v62 = vsel %vm1147_vm2, %v1846_v9, %v1847_v26  ;;  %1974 = vmatpush.bf16.msrb.mxu2 %v2289_v22  ;;  %vm1883_vm2 = vcmask 523264   ;;  %v2356_v9 = vld [vmem:[%s3417_s8] ss:$0 sm:$0xff] }
 0x370   : > { %v1839_v8 = vsel %vm478_vm1, %v1834_v46, %v1838_v25  ;;  %v1858_v54 = vor.u32 %v1857_v20, %v1856_v61  ;;  %v1775_v32 = vpack.c.bf16 %v1770_v14, %v1770_v14  ;;  %vm1878_vm1 = vcmask 392192  }
 0x371   : > { %1842 = vrot.lane.b32.xlu2 %v1839_v8, %s2381_s19 }
 0x372   : > { %v1859_v3 = vsel %vm1544_vm3, %v1855_v15, %v1858_v54  ;;  %v1865_v27 = vunpack.c.l.b16 %v1775_v32 }
 0x373   : > { %1849 = vrot.lane.b32.xlu0 %v1848_v62, %s2386_s11  ;;  %v1764_v4 = vpop.f32.mrf.mxu1 }
 0x374   : > { %1860 = vrot.lane.b32.xlu1 %v1859_v3, %s2387_s14  ;;  %v1867_v23 = vpack.c.b16 %v1865_v27, %v1865_v27 }
 0x379   : > { %1800 = vrot.lane.b32.xlu2 %v1796_v51, %s2385_s27 }
 0x37b   : > { %1807 = vrot.lane.b32.xlu0 %v1803_v48, %s2383_s21 }
 0x37c   : > { %1818 = vrot.lane.b32.xlu1 %v1812_v36, %s2384_s24  ;;  %2266 = vmatmul.msk.bf16.gmra.mxu3 %vm1868_vm12, %v1867_v23 }
 0x381   : > { %1826 = vrot.lane.b32.xlu2 %v1823_v63, %s2382_s20 }
 0x383   : > { %1844 = vrot.lane.b32.xlu0 %v1840_v19, %s2381_s19 }
 0x384   : > { %1851 = vrot.lane.b32.xlu1 %v1847_v26, %s2386_s11 }
 0x389   : > { %1862 = vrot.lane.b32.xlu2 %v1856_v61, %s2387_s14 }
 0x3c1   : > { %v1806_v38 = vpop.permute.xlu2 %1805 }
 0x3cb   : > { %v1843_v10 = vpop.permute.xlu2 %1842 }
 0x3d3   : > { %v1801_v34 = vpop.permute.xlu2 %1800 }
 0x3d4   : > { %v1872_v45 = vsel %vm1868_vm12, %v3320_v39, %v1801_v34 }
 0x3d6   : > { %v1825_v28 = vpop.permute.xlu1 %1824 }
 0x3db   : > { %v1827_v55 = vpop.permute.xlu2 %1826 }
 0x3dd   : > { %v1817_v50 = vpop.permute.xlu0 %1816 }
 0x3de   : > { %v1799_v43 = vpop.permute.xlu1 %1798 }
 0x3df   : > { %v1870_v56 = vsel %vm1868_vm12, %v3316_v33, %v1799_v43  ;;  %v2299_v33 = vld [vmem:[%s3416_s7 + $0x8] sm:$0xff] }
 0x3e0   : > { %v1875_v40 = vsel %vm1873_vm0, %v1870_v56, %v1806_v38  ;;  %2035 = vmatpush.bf16.msra.mxu3 %v2299_v33 }
 0x3e1   : > { %v1880_v44 = vsel %vm1878_vm1, %v1875_v40, %v1817_v50 }
 0x3e2   : > { %v1885_v35 = vsel %vm1883_vm2, %v1880_v44, %v1825_v28 }
 0x3e3   : > { %v1889_v49 = vsel %vm1688_vm10, %v1885_v35, %v1843_v10  ;;  %v1863_v52 = vpop.permute.xlu2 %1862 }
 0x3e4   : > { %2036 = vmatpush.bf16.msra.mxu3 %v2298_v16 }
 0x3e5   : > { %v1850_v17 = vpop.permute.xlu0 %1849 }
 0x3e6   : > { %v1894_v48 = vsel %vm1892_vm13, %v1889_v49, %v1850_v17  ;;  %v1861_v60 = vpop.permute.xlu1 %1860 }
 0x3e7   : > { %v1899_v51 = vsel %vm1897_vm14, %v1894_v48, %v1861_v60 }
 0x3e8   : > { %1975 = vmatmul.bf16.vlgmr.msrb.gmra.mxu2 %v1899_v51 }
 0x3ed   : > { %v1808_v53 = vpop.permute.xlu0 %1807 }
 0x3ee   : > { %v1819_v0 = vpop.permute.xlu1 %1818  ;;  %v1877_v36 = vsel %vm1873_vm0, %v1872_v45, %v1808_v53 }
 0x3ef   : > { %v1994_v58 = vpop.f32.mrf.mxu3  ;;  %v1882_v41 = vsel %vm1878_vm1, %v1877_v36, %v1819_v0 }
 0x3f0   : > { %v1887_v5 = vsel %vm1883_vm2, %v1882_v41, %v1827_v55 }
 0x3f5   : > { %v1845_v12 = vpop.permute.xlu0 %1844 }
 0x3f6   : > { %v1891_v59 = vsel %vm1688_vm10, %v1887_v5, %v1845_v12  ;;  %v1852_v21 = vpop.permute.xlu1 %1851 }
 0x3f7   : > { %v1896_v30 = vsel %vm1892_vm13, %v1891_v59, %v1852_v21  ;;  %v1996_v24 = vpop.f32.mrf.mxu3 }
 0x3f8   : > { %v1902_v63 = vsel %vm1897_vm14, %v1896_v30, %v1863_v52 }
 0x3f9   : > { %1980 = vmatmul.bf16.gmra.mxu2 %v1902_v63 }
 0x3ff   : > { %v1999_v39 = vpop.f32.mrf.mxu3 }
 0x407   : > { %v2001_v11 = vpop.f32.mrf.mxu3 }
 0x46b   : > { %v1976_v37 = vpop.f32.mrf.mxu2 }
 0x46c   : > { %v1977_v18 = vadd.f32 %v2355_v13, %v1976_v37 }
 0x46e   : > { %v1995_v2 = vadd.f32 %v1994_v58, %v1977_v18 }
 0x470   : > { %v2003_v1 = vmax.f32 %v1995_v2, 0.0 }
 0x473   : > { %v1978_v6 = vpop.f32.mrf.mxu2 }
 0x474   : > { %v1979_v19 = vadd.f32 %v2355_v13, %v1978_v6 }
 0x476   : > { %v1997_v46 = vadd.f32 %v1996_v24, %v1979_v19 }
 0x478   : > { %v2004_v57 = vmax.f32 %v1997_v46, 0.0 }
 0x47a   : > { %v2006_v14 = vpack.c.bf16 %v2004_v57, %v2003_v1 }
 0x47c   : > { %v1981_v25 = vpop.f32.mrf.mxu2  ;;  %2275 = vmatmul.msk.bf16.vlgmr.msra.gmra.mxu3 %vm1873_vm0, %v2006_v14 }
 0x47d   : > { %v1982_v26 = vadd.f32 %v2355_v13, %v1981_v25 }
 0x47f   : > { %v2000_v61 = vadd.f32 %v1999_v39, %v1982_v26 }
 0x481   : > { %v2005_v47 = vmax.f32 %v2000_v61, 0.0 }
 0x483   : > { %v2007_v8 = vpack.c.bf16 %v2005_v47, %v2005_v47 }
 0x484   : > { %v1983_v20 = vpop.f32.mrf.mxu2 }
 0x48c   : > { %2276 = vmatmul.msk.bf16.gmra.mxu3 %vm1873_vm0, %v2007_v8 }
 0x4ff   : > { %v2038_v15 = vpop.f32.mrf.mxu3 }
 0x500   : > { %v2039_v54 = vadd.f32 %v2356_v9, %v2038_v15 }
 0x502   : > { %2047 = vst [vmem:[%s332_s15] sm:$0x7] %v2039_v54 }
 0x503   : > { %2048 = vst [vmem:[%s332_s15 - $0x4] sm:$0x80] %v2039_v54 }
 0x507   : > { %v2040_v32 = vpop.f32.mrf.mxu3 }
 0x508   : > { %v2041_v62 = vadd.f32 %v2356_v9, %v2040_v32 }
 0x50a   : > { %2049 = vst [vmem:[%s332_s15 + $0x4] sm:$0x3] %v2041_v62 }
 0x50b   : > { %2050 = vst [vmem:[%s332_s15] sm:$0xc0] %v2041_v62 }
 0x50f   : > { %v2043_v4 = vpop.f32.mrf.mxu3 }
 0x510   : > { %v2044_v3 = vadd.f32 %v2356_v9, %v2043_v4 }
 0x512   : > { %2051 = vst [vmem:[%s332_s15 + $0x8] sm:$0x1] %v2044_v3 }
 0x517   : > { %v2045_v29 = vpop.f32.mrf.mxu3 }
 0x518 PF: > { %s19_s30 = sadd.s32 1, %s2363_s30  }
 0x519   : > { %p16_p4 = scmp.ge.s32.totalorder %s19_s30, 4  }
 0x51b   :  { %18 = sbr.rel (!%p16_p4) target bundleno = 1 (0x1), region = 92 }

</bundles_post_ra>
